<compile_context>
chip_gen: v5e
topology: v5e:2x2
jax: 0.10.0
libtpu: 0.0.40
codegen_flags: <defaults>
</compile_context>

<pallas_src>
import jax
import jax.numpy as jnp
from jax.experimental import pallas as pl
from jax.experimental.pallas import tpu as pltpu


# -----------------------------------------------------------------------------
# Kernels.  Each grid step owns a TM-row block of the output; the (small)
# node-feature matrices / weights stay fully resident, the big adjacency is
# streamed in (TM, N) row blocks (auto double-buffered by BlockSpec pipelining).
# -----------------------------------------------------------------------------
def _gcn_layer1_kernel(adj_ref, z_ref, wz_ref, mat_ref, wm_ref, b1_ref, w2_ref,
                       out_ref):
    f32 = jnp.float32
    # x @ W1  ==  z @ W1z + m @ W1m   (exact equivalent of the torch.cat path).
    # Full-node feature transform; tiny vs. the adjacency matmul (<~2% of MACs).
    xw = jnp.dot(z_ref[...], wz_ref[...], preferred_element_type=f32)
    xw = xw + jnp.dot(mat_ref[...], wm_ref[...], preferred_element_type=f32)
    # adjacency propagation on the MXU in bf16, accumulate in f32
    h = jnp.dot(adj_ref[...], xw.astype(adj_ref.dtype), preferred_element_type=f32)
    h = jnp.maximum(h + b1_ref[...], 0.0)                       # ReLU
    # fuse layer-2 feature transform (block-local rows of h1 @ W2)
    hw = jnp.dot(h, w2_ref[...], preferred_element_type=f32)
    out_ref[...] = hw.astype(out_ref.dtype)                     # bf16 intermediate


def _gcn_layer2_kernel(adj_ref, hw_ref, b2_ref, out_ref):
    out = jnp.dot(adj_ref[...], hw_ref[...], preferred_element_type=jnp.float32)
    out_ref[...] = (out + b2_ref[...]).astype(out_ref.dtype)


# -----------------------------------------------------------------------------
# Glue: normalized adjacency, tiling decisions, pallas_call wrappers.
# -----------------------------------------------------------------------------
def edge_index_to_norm_adj(edge_index, num_nodes):
    """edge_index [2, E] -> dense D^-1/2 (A + I) D^-1/2, f32 (plain JAX scatter)."""
    src, dst = edge_index[0], edge_index[1]
    a = jnp.zeros((num_nodes, num_nodes), jnp.float32)
    a = a.at[src, dst].add(1.0)
    a = a.at[dst, src].add(1.0)
    a = jnp.minimum(a, 1.0)                                     # de-dup multi-edges
    a = jnp.maximum(a, jnp.eye(num_nodes, dtype=jnp.float32))   # exactly one self loop
    deg = jnp.sum(a, axis=1)
    d_inv_sqrt = jax.lax.rsqrt(jnp.maximum(deg, 1e-12))
    return a * d_inv_sqrt[:, None] * d_inv_sqrt[None, :]


def _pick_tile_rows(n, vmem_budget_bytes):
    """Pick row-tile TM and padded node count (lane-aligned, bf16 adj budget)."""
    n_pad = max(128, pl.cdiv(n, 128) * 128)

    def fits(tm):
        # double-buffered bf16 adjacency tile must fit in ~half the budget
        return 2 * tm * n_pad * 2 <= vmem_budget_bytes // 2

    # tiny graphs: one grid step, no pipelining overhead
    if n_pad <= 512 and fits(n_pad):
        return n_pad, n_pad
    for cand in (1024, 512, 256, 128):
        if n_pad % cand == 0 and fits(cand):
            return cand, n_pad
    return 128, n_pad


def _vmem_limit_bytes(tm, n_pad, latent, mdim, out_dim):
    adj_bytes = 2 * tm * n_pad * 2                        # double-buffered bf16 adj tile
    feat_bytes = n_pad * (latent + mdim) * 4 + n_pad * max(out_dim, 8) * 2
    weight_bytes = (latent * latent + mdim * latent + latent * out_dim
                    + latent + out_dim) * 4
    out_bytes = 2 * tm * max(latent, out_dim, 8) * 4      # double-buffered output tile
    need = adj_bytes + 2 * feat_bytes + weight_bytes + out_bytes + (4 << 20)
    return int(min(max(need, 16 << 20), 48 << 20))        # stay under v7x's 64 MiB


def graph_decoder_forward(z, edge_index, material_params, params,
                          *, vmem_budget_bytes=24 << 20):
    """GraphDecoder forward. material_params may be [P] (shared) or [N, P]."""
    z = z.astype(jnp.float32)
    n, latent = z.shape
    out_dim = params["w2"].shape[1]
    mdim = params["w1m"].shape[0]

    mat = jnp.atleast_2d(jnp.asarray(material_params, jnp.float32))  # [1,P] or [N,P]

    tm, n_pad = _pick_tile_rows(n, vmem_budget_bytes)
    grid = (n_pad // tm,)

    adj = edge_index_to_norm_adj(edge_index, n)
    adj_p = jnp.zeros((n_pad, n_pad), jnp.float32).at[:n, :n].set(adj)
    adj_p = adj_p.astype(jnp.bfloat16)                   # bf16 adjacency for the MXU
    z_p = jnp.zeros((n_pad, latent), jnp.float32).at[:n].set(z)
    if mat.shape[0] == n and n_pad != n:
        mat = jnp.zeros((n_pad, mdim), jnp.float32).at[:n].set(mat)
    mat_rows = mat.shape[0]

    adj_spec = pl.BlockSpec((tm, n_pad), lambda i: (i, 0))

    def full_spec(shape):
        return pl.BlockSpec(shape, lambda i: (0, 0))

    compiler_params = pltpu.CompilerParams(
        dimension_semantics=("parallel",),
        vmem_limit_bytes=_vmem_limit_bytes(tm, n_pad, latent, mdim, out_dim),
    )

    # ---- layer 1 (+ fused layer-2 feature transform) -------------------------
    #   h1w = relu( A_hat @ (z @ W1z + m @ W1m) + b1 ) @ W2      (bf16 intermediate)
    h1w = pl.pallas_call(
        _gcn_layer1_kernel,
        out_shape=jax.ShapeDtypeStruct((n_pad, out_dim), jnp.bfloat16),
        grid=grid,
        in_specs=[
            adj_spec,
            full_spec((n_pad, latent)),
            full_spec((latent, latent)),
            full_spec((mat_rows, mdim)),
            full_spec((mdim, latent)),
            full_spec((1, latent)),
            full_spec((latent, out_dim)),
        ],
        out_specs=pl.BlockSpec((tm, out_dim), lambda i: (i, 0)),
        compiler_params=compiler_params,
    )(adj_p, z_p, params["w1z"], mat, params["w1m"], params["b1"], params["w2"])

    # ---- layer 2 propagation: out = A_hat @ h1w + b2 --------------------------
    out_p = pl.pallas_call(
        _gcn_layer2_kernel,
        out_shape=jax.ShapeDtypeStruct((n_pad, out_dim), jnp.float32),
        grid=grid,
        in_specs=[
            adj_spec,
            full_spec((n_pad, out_dim)),
            full_spec((1, out_dim)),
        ],
        out_specs=pl.BlockSpec((tm, out_dim), lambda i: (i, 0)),
        compiler_params=compiler_params,
    )(adj_p, h1w, params["b2"])

    return out_p[:n]


# -----------------------------------------------------------------------------
# Pure-JAX reference (f32, dense) for a tolerance check.
# -----------------------------------------------------------------------------
def graph_decoder_reference(z, edge_index, material_params, params):
    n = z.shape[0]
    adj = edge_index_to_norm_adj(edge_index, n)
    m = jnp.atleast_2d(jnp.asarray(material_params, jnp.float32))
    m = jnp.broadcast_to(m, (n, m.shape[1]))
    x = jnp.concatenate([z.astype(jnp.float32), m], axis=1)
    w1 = jnp.concatenate([params["w1z"], params["w1m"]], axis=0)
    h = jnp.maximum(adj @ (x @ w1) + params["b1"], 0.0)
    return adj @ (h @ params["w2"]) + params["b2"]


def init_params(key, latent_dim, output_dim, material_dim):
    ks = jax.random.split(key, 3)
    s = 0.2
    return {
        # conv1 weight [(latent+material), latent] stored split as (w1z, w1m)
        "w1z": s * jax.random.normal(ks[0], (latent_dim, latent_dim), jnp.float32),
        "w1m": s * jax.random.normal(ks[1], (material_dim, latent_dim), jnp.float32),
        "b1": jnp.zeros((1, latent_dim), jnp.float32),
        "w2": s * jax.random.normal(ks[2], (latent_dim, output_dim), jnp.float32),
        "b2": jnp.zeros((1, output_dim), jnp.float32),
    }


if __name__ == "__main__":
    N, LATENT, MAT, OUT = 300, 8, 4, 3   # nodes, latent_dim, material_dim, output_dim

    key = jax.random.PRNGKey(0)
    kz, km, kp = jax.random.split(key, 3)

    z = jax.random.normal(kz, (N, LATENT), jnp.float32)
    material_params = jax.random.normal(km, (MAT,), jnp.float32)   # shared over nodes
    params = init_params(kp, LATENT, OUT, MAT)

    # deterministic sparse mesh-like graph: ring edges + skip-5 chords
    idx = jnp.arange(N, dtype=jnp.int32)
    src = jnp.concatenate([idx, idx])
    dst = jnp.concatenate([(idx + 1) % N, (idx + 5) % N])
    edge_index = jnp.stack([src, dst], axis=0)

    out = graph_decoder_forward(z, edge_index, material_params, params)
    jax.block_until_ready(out)
    assert out.shape == (N, OUT)

    ref = graph_decoder_reference(z, edge_index, material_params, params)
    max_err = float(jnp.max(jnp.abs(out - ref)))
    assert jnp.allclose(out, ref, atol=3e-2, rtol=3e-2), f"max_err={max_err}"

    print("KERNEL_OK")
</pallas_src>

<mosaic_0001>
module attributes {stable_mosaic.version = 11 : i64} {
  func.func @_gcn_layer1_kernel(%arg0: i32, %arg1: memref<384x384xbf16, #tpu.memory_space<vmem>>, %arg2: memref<384x8xf32, #tpu.memory_space<vmem>>, %arg3: memref<8x8xf32, #tpu.memory_space<vmem>>, %arg4: memref<1x4xf32, #tpu.memory_space<vmem>>, %arg5: memref<4x8xf32, #tpu.memory_space<vmem>>, %arg6: memref<1x8xf32, #tpu.memory_space<vmem>>, %arg7: memref<8x3xf32, #tpu.memory_space<vmem>>, %arg8: memref<384x3xbf16, #tpu.memory_space<vmem>>) attributes {dimension_semantics = [#tpu.dimension_semantics<parallel>], iteration_bounds = array<i64: 1>, scalar_prefetch = 0 : i64, scratch_operands = 0 : i64, tpu.core_type = #tpu.core_type<tc>, window_params = [{transform_indices = @transform_0, window_bounds = array<i64: 384, 384>}, {pipeline_mode = #tpu.pipeline_mode<synchronous>, transform_indices = @transform_1, window_bounds = array<i64: 384, 8>}, {pipeline_mode = #tpu.pipeline_mode<synchronous>, transform_indices = @transform_2, window_bounds = array<i64: 8, 8>}, {pipeline_mode = #tpu.pipeline_mode<synchronous>, transform_indices = @transform_3, window_bounds = array<i64: 1, 4>}, {pipeline_mode = #tpu.pipeline_mode<synchronous>, transform_indices = @transform_4, window_bounds = array<i64: 4, 8>}, {pipeline_mode = #tpu.pipeline_mode<synchronous>, transform_indices = @transform_5, window_bounds = array<i64: 1, 8>}, {pipeline_mode = #tpu.pipeline_mode<synchronous>, transform_indices = @transform_6, window_bounds = array<i64: 8, 3>}, {transform_indices = @transform_7, window_bounds = array<i64: 384, 3>}]} {
    %c0 = arith.constant 0 : index
    %c0_0 = arith.constant 0 : index
    %0 = vector.load %arg2[%c0, %c0_0] : memref<384x8xf32, #tpu.memory_space<vmem>>, vector<384x8xf32>
    %c0_1 = arith.constant 0 : index
    %c0_2 = arith.constant 0 : index
    %1 = vector.load %arg3[%c0_1, %c0_2] : memref<8x8xf32, #tpu.memory_space<vmem>>, vector<8x8xf32>
    %cst = arith.constant dense<0.000000e+00> : vector<384x8xf32>
    %2 = tpu.matmul %0, %1, %cst {dimension_numbers = #tpu.dot_dimension_numbers<[1], [0], [0], [1], [0, 0, 1, 1], [], []>} : vector<384x8xf32>, vector<8x8xf32>, vector<384x8xf32> -> vector<384x8xf32>
    %c0_3 = arith.constant 0 : index
    %c0_4 = arith.constant 0 : index
    %3 = vector.load %arg4[%c0_3, %c0_4] : memref<1x4xf32, #tpu.memory_space<vmem>>, vector<1x4xf32>
    %c0_5 = arith.constant 0 : index
    %c0_6 = arith.constant 0 : index
    %4 = vector.load %arg5[%c0_5, %c0_6] : memref<4x8xf32, #tpu.memory_space<vmem>>, vector<4x8xf32>
    %cst_7 = arith.constant dense<0.000000e+00> : vector<1x8xf32>
    %5 = tpu.matmul %3, %4, %cst_7 {dimension_numbers = #tpu.dot_dimension_numbers<[1], [0], [0], [1], [0, 0, 1, 1], [], []>} : vector<1x4xf32>, vector<4x8xf32>, vector<1x8xf32> -> vector<1x8xf32>
    %6 = vector.broadcast %5 : vector<1x8xf32> to vector<384x8xf32>
    %7 = arith.addf %2, %6 : vector<384x8xf32>
    %c0_8 = arith.constant 0 : index
    %c0_9 = arith.constant 0 : index
    %8 = vector.load %arg1[%c0_8, %c0_9] : memref<384x384xbf16, #tpu.memory_space<vmem>>, vector<384x384xbf16>
    %9 = arith.truncf %7 : vector<384x8xf32> to vector<384x8xbf16>
    %cst_10 = arith.constant dense<0.000000e+00> : vector<384x8xf32>
    %10 = tpu.matmul %8, %9, %cst_10 {dimension_numbers = #tpu.dot_dimension_numbers<[1], [0], [0], [1], [0, 0, 1, 1], [], []>} : vector<384x384xbf16>, vector<384x8xbf16>, vector<384x8xf32> -> vector<384x8xf32>
    %c0_11 = arith.constant 0 : index
    %c0_12 = arith.constant 0 : index
    %11 = vector.load %arg6[%c0_11, %c0_12] : memref<1x8xf32, #tpu.memory_space<vmem>>, vector<1x8xf32>
    %12 = vector.broadcast %11 : vector<1x8xf32> to vector<384x8xf32>
    %13 = arith.addf %10, %12 : vector<384x8xf32>
    %cst_13 = arith.constant 0.000000e+00 : f32
    %14 = vector.broadcast %cst_13 : f32 to vector<384x8xf32>
    %15 = arith.maximumf %13, %14 : vector<384x8xf32>
    %c0_14 = arith.constant 0 : index
    %c0_15 = arith.constant 0 : index
    %16 = vector.load %arg7[%c0_14, %c0_15] : memref<8x3xf32, #tpu.memory_space<vmem>>, vector<8x3xf32>
    %cst_16 = arith.constant dense<0.000000e+00> : vector<384x3xf32>
    %17 = tpu.matmul %15, %16, %cst_16 {dimension_numbers = #tpu.dot_dimension_numbers<[1], [0], [0], [1], [0, 0, 1, 1], [], []>} : vector<384x8xf32>, vector<8x3xf32>, vector<384x3xf32> -> vector<384x3xf32>
    %18 = arith.truncf %17 : vector<384x3xf32> to vector<384x3xbf16>
    %c0_17 = arith.constant 0 : index
    %c0_18 = arith.constant 0 : index
    %19 = vector.load %arg8[%c0_17, %c0_18] : memref<384x3xbf16, #tpu.memory_space<vmem>>, vector<384x3xbf16>
    tpu.vector_store %arg8[%c0_17, %c0_18], %18 {strides = array<i32>} : memref<384x3xbf16, #tpu.memory_space<vmem>>, vector<384x3xbf16>,
    return
  }
  func.func @transform_0(%arg0: i32) -> (i32, i32) {
    %c0_i32 = arith.constant 0 : i32
    %c0_i32_0 = arith.constant 0 : i32
    return %arg0, %c0_i32 : i32, i32
  }
  func.func @transform_1(%arg0: i32) -> (i32, i32) {
    %c0_i32 = arith.constant 0 : i32
    %c0_i32_0 = arith.constant 0 : i32
    %c0_i32_1 = arith.constant 0 : i32
    return %c0_i32, %c0_i32_0 : i32, i32
  }
  func.func @transform_2(%arg0: i32) -> (i32, i32) {
    %c0_i32 = arith.constant 0 : i32
    %c0_i32_0 = arith.constant 0 : i32
    %c0_i32_1 = arith.constant 0 : i32
    return %c0_i32, %c0_i32_0 : i32, i32
  }
  func.func @transform_3(%arg0: i32) -> (i32, i32) {
    %c0_i32 = arith.constant 0 : i32
    %c0_i32_0 = arith.constant 0 : i32
    %c0_i32_1 = arith.constant 0 : i32
    return %c0_i32, %c0_i32_0 : i32, i32
  }
  func.func @transform_4(%arg0: i32) -> (i32, i32) {
    %c0_i32 = arith.constant 0 : i32
    %c0_i32_0 = arith.constant 0 : i32
    %c0_i32_1 = arith.constant 0 : i32
    return %c0_i32, %c0_i32_0 : i32, i32
  }
  func.func @transform_5(%arg0: i32) -> (i32, i32) {
    %c0_i32 = arith.constant 0 : i32
    %c0_i32_0 = arith.constant 0 : i32
    %c0_i32_1 = arith.constant 0 : i32
    return %c0_i32, %c0_i32_0 : i32, i32
  }
  func.func @transform_6(%arg0: i32) -> (i32, i32) {
    %c0_i32 = arith.constant 0 : i32
    %c0_i32_0 = arith.constant 0 : i32
    %c0_i32_1 = arith.constant 0 : i32
    return %c0_i32, %c0_i32_0 : i32, i32
  }
  func.func @transform_7(%arg0: i32) -> (i32, i32) {
    %c0_i32 = arith.constant 0 : i32
    %c0_i32_0 = arith.constant 0 : i32
    return %arg0, %c0_i32 : i32, i32
  }
}

</mosaic_0001>

<bundles_post_ra>
// kernel: tpu_custom_call.1
= control target key start
LH: loop header
LB: loop body
LE: loop exit
PB: predicated region body
PF: predicated region fallthrough
CT: control target
= control target key end

     0   :  { %12 = vsyncpa [#allocation3], 0  ;;  %s2272_s27 = smov [#allocation2]   ;;  %s2273_s29 = smov 192   ;;  %s2978_s0 = inlined_call_operand.hbm [shape: bf16[384,384], index: 0, kind: input, shape index: {}]   ;;  %s2979_s1 = inlined_call_operand.vmem [shape: f32[384,8], index: 1, kind: input, shape index: {}]   ;;  %s2980_s2 = inlined_call_operand.vmem [shape: f32[8,8], index: 2, kind: input, shape index: {}]   ;;  %s2981_s3 = inlined_call_operand.vmem [shape: f32[1,4], index: 3, kind: input, shape index: {}]   ;;  %s2982_s4 = inlined_call_operand.vmem [shape: f32[4,8], index: 4, kind: input, shape index: {}]   ;;  %s2983_s5 = inlined_call_operand.vmem [shape: f32[1,8], index: 5, kind: input, shape index: {}]   ;;  %s2984_s6 = inlined_call_operand.vmem [shape: f32[8,3], index: 6, kind: input, shape index: {}]   ;;  %s2985_s7 = inlined_call_operand.vmem [shape: bf16[384,3], index: 7, kind: output, shape index: {}]  }
   0x1   :  { %s17_s26 = sshll.u32 %s2978_s0, 4  ;;  %s19_s28 = sshll.u32 %s2272_s27, 4  ;;  %s18_s26 = int_to_ptr.hbm [resolvable:$true] %s17_s26  ;;  %s20_s28 = int_to_ptr.vmem [resolvable:$true] %s19_s28 }
   0x2   :  { %s2274_s30 = smov 12  }
   0x3   :  { %25 = dma.hbm_to_vmem [thread:$0]  %s18_s26, 9216, %s20_s28, [#allocation3], %s2273_s29, %s2273_s29, %s2274_s30  }
   0x4   :  { %2270 = dma.done.wait [#allocation3], 9216  }
   0x5   :  { %2271 = vsyncadd [#allocation3], 4294958080  ;;  %vm122_vm0 = vcmask 64512   ;;  %v90_v0 = vld [vmem:[%s2980_s2] sm:$0xff]  ;;  %v64_v2 = vld [vmem:[%s2979_s1 + $0xb0] sm:$0xff]  ;;  %vm97_vm1 = vcmask 1043456  }
   0x6   :  { %v50_v1 = vld [vmem:[%s2979_s1 + $0x40] sm:$0xff]  ;;  %2237 = vmatpush.msra.mxu1 %v90_v0  ;;  %2238 = vmatpush.msra.mxu2 %v90_v0  ;;  %v77_v3 = vld [vmem:[%s2979_s1 + $0x118] sm:$0xff]  ;;  %vm93_vm2 = vcmask 31744   ;;  %v51_v6 = vld [vmem:[%s2979_s1 + $0x48] sm:$0xff]  ;;  %vm1725_vm3 = vcmask 19456  }
   0x7   :  { %v92_v4 = vld [vmem:[%s2982_s4] sm:$0xf]  ;;  %2239 = vmatpush.msra.mxu3 %v90_v0  ;;  %1789 = vmatmul.msk.f32.vlgmr.msra.gmra.mxu1 %vm122_vm0, %v50_v1  ;;  %v65_v7 = vld [vmem:[%s2979_s1 + $0xb8] sm:$0xff]  ;;  %v52_v10 = vld [vmem:[%s2979_s1 + $0x50] sm:$0xff] }
   0x8   :  { %v91_v5 = vld [vmem:[%s2981_s3] sm:$0x1]  ;;  %1803 = vmatmul.msk.f32.vlgmr.msra.gmra.mxu2 %vm122_vm0, %v64_v2  ;;  %1816 = vmatmul.msk.f32.vlgmr.msra.gmra.mxu3 %vm122_vm0, %v77_v3  ;;  %v79_v12 = vld [vmem:[%s2979_s1 + $0x128] sm:$0xff]  ;;  %v53_v14 = vld [vmem:[%s2979_s1 + $0x58] sm:$0xff] }
   0x9   :  { %1779 = vmatpush.msk.msra.mxu0 %vm97_vm1, %v92_v4  ;;  %v78_v8 = vld [vmem:[%s2979_s1 + $0x120] sm:$0xff]  ;;  %v43_v13 = vld [vmem:[%s2979_s1 + $0x8] sm:$0xff]  ;;  %v80_v16 = vld [vmem:[%s2979_s1 + $0x130] sm:$0xff] }
   0xa   :  { %1780 = vmatmul.msk.f32.vlgmr.msra.gmra.mxu0 %vm93_vm2, %v91_v5  ;;  %v42_v9 = vld [vmem:[%s2979_s1] sm:$0xff]  ;;  %v67_v15 = vld [vmem:[%s2979_s1 + $0xc8] sm:$0xff]  ;;  %v44_v17 = vld [vmem:[%s2979_s1 + $0x10] sm:$0xff] }
   0xb   :  { %282 = vmatpush.msrb.mxu0 %v90_v0  ;;  %v66_v11 = vld [vmem:[%s2979_s1 + $0xc0] sm:$0xff]  ;;  %v68_v19 = vld [vmem:[%s2979_s1 + $0xd0] sm:$0xff]  ;;  %v81_v20 = vld [vmem:[%s2979_s1 + $0x138] sm:$0xff] }
   0xc   :  { %v54_v18 = vld [vmem:[%s2979_s1 + $0x60] sm:$0xff]  ;;  %v45_v21 = vld [vmem:[%s2979_s1 + $0x18] sm:$0xff]  ;;  %v55_v22 = vld [vmem:[%s2979_s1 + $0x68] sm:$0xff] }
   0xd   :  { %v69_v23 = vld [vmem:[%s2979_s1 + $0xd8] sm:$0xff]  ;;  %v82_v24 = vld [vmem:[%s2979_s1 + $0x140] sm:$0xff]  ;;  %v56_v26 = vld [vmem:[%s2979_s1 + $0x70] sm:$0xff] }
   0xe   :  { %v46_v25 = vld [vmem:[%s2979_s1 + $0x20] sm:$0xff]  ;;  %v83_v28 = vld [vmem:[%s2979_s1 + $0x148] sm:$0xff]  ;;  %v57_v30 = vld [vmem:[%s2979_s1 + $0x78] sm:$0xff] }
   0xf   :  { %1790 = vmatmul.msk.f32.gmra.mxu1 %vm122_vm0, %v51_v6  ;;  %v70_v27 = vld [vmem:[%s2979_s1 + $0xe0] sm:$0xff]  ;;  %v47_v29 = vld [vmem:[%s2979_s1 + $0x28] sm:$0xff]  ;;  %v84_v32 = vld [vmem:[%s2979_s1 + $0x150] sm:$0xff] }
  0x10   :  { %1804 = vmatmul.msk.f32.gmra.mxu2 %vm122_vm0, %v65_v7  ;;  %1817 = vmatmul.msk.f32.gmra.mxu3 %vm122_vm0, %v78_v8  ;;  %v71_v31 = vld [vmem:[%s2979_s1 + $0xe8] sm:$0xff]  ;;  %v48_v33 = vld [vmem:[%s2979_s1 + $0x30] sm:$0xff]  ;;  %v58_v34 = vld [vmem:[%s2979_s1 + $0x80] sm:$0xff] }
  0x11   :  { %v72_v35 = vld [vmem:[%s2979_s1 + $0xf0] sm:$0xff]  ;;  %v85_v36 = vld [vmem:[%s2979_s1 + $0x158] sm:$0xff]  ;;  %v59_v38 = vld [vmem:[%s2979_s1 + $0x88] sm:$0xff] }
  0x12   :  { %1781 = vmatmul.msk.f32.vlgmr.msrb.gmra.mxu0 %vm122_vm0, %v42_v9  ;;  %v49_v37 = vld [vmem:[%s2979_s1 + $0x38] sm:$0xff]  ;;  %v86_v40 = vld [vmem:[%s2979_s1 + $0x160] sm:$0xff]  ;;  %v60_v41 = vld [vmem:[%s2979_s1 + $0x90] sm:$0xff] }
  0x13   :  { %v73_v39 = vld [vmem:[%s2979_s1 + $0xf8] sm:$0xff]  ;;  %v74_v42 = vld [vmem:[%s2979_s1 + $0x100] sm:$0xff]  ;;  %v87_v43 = vld [vmem:[%s2979_s1 + $0x168] sm:$0xff] }
  0x14   :  { %v61_v44 = vld [vmem:[%s2979_s1 + $0x98] sm:$0xff]  ;;  %v75_v45 = vld [vmem:[%s2979_s1 + $0x108] sm:$0xff]  ;;  %v88_v46 = vld [vmem:[%s2979_s1 + $0x170] sm:$0xff] }
  0x15   :  { %v62_v47 = vld [vmem:[%s2979_s1 + $0xa0] sm:$0xff]  ;;  %v76_v48 = vld [vmem:[%s2979_s1 + $0x110] sm:$0xff]  ;;  %v89_v49 = vld [vmem:[%s2979_s1 + $0x178] sm:$0xff] }
  0x16   :  { %v63_v50 = vld [vmem:[%s2979_s1 + $0xa8] sm:$0xff] }
  0x17   :  { %1791 = vmatmul.msk.f32.gmra.mxu1 %vm122_vm0, %v52_v10 }
  0x18   :  { %1805 = vmatmul.msk.f32.gmra.mxu2 %vm122_vm0, %v66_v11  ;;  %1818 = vmatmul.msk.f32.gmra.mxu3 %vm122_vm0, %v79_v12 }
  0x1a   :  { %1782 = vmatmul.msk.f32.gmra.mxu0 %vm122_vm0, %v43_v13 }
  0x1f   :  { %1792 = vmatmul.msk.f32.gmra.mxu1 %vm122_vm0, %v53_v14 }
  0x20   :  { %1806 = vmatmul.msk.f32.gmra.mxu2 %vm122_vm0, %v67_v15  ;;  %1819 = vmatmul.msk.f32.gmra.mxu3 %vm122_vm0, %v80_v16 }
  0x22   :  { %1783 = vmatmul.msk.f32.gmra.mxu0 %vm122_vm0, %v44_v17 }
  0x27   :  { %1793 = vmatmul.msk.f32.gmra.mxu1 %vm122_vm0, %v54_v18 }
  0x28   :  { %1807 = vmatmul.msk.f32.gmra.mxu2 %vm122_vm0, %v68_v19  ;;  %1820 = vmatmul.msk.f32.gmra.mxu3 %vm122_vm0, %v81_v20 }
  0x2a   :  { %1784 = vmatmul.msk.f32.gmra.mxu0 %vm122_vm0, %v45_v21 }
  0x2f   :  { %1794 = vmatmul.msk.f32.gmra.mxu1 %vm122_vm0, %v55_v22 }
  0x30   :  { %1808 = vmatmul.msk.f32.gmra.mxu2 %vm122_vm0, %v69_v23  ;;  %1821 = vmatmul.msk.f32.gmra.mxu3 %vm122_vm0, %v82_v24 }
  0x32   :  { %1785 = vmatmul.msk.f32.gmra.mxu0 %vm122_vm0, %v46_v25 }
  0x37   :  { %1795 = vmatmul.msk.f32.gmra.mxu1 %vm122_vm0, %v56_v26 }
  0x38   :  { %1809 = vmatmul.msk.f32.gmra.mxu2 %vm122_vm0, %v70_v27  ;;  %1822 = vmatmul.msk.f32.gmra.mxu3 %vm122_vm0, %v83_v28 }
  0x3a   :  { %1786 = vmatmul.msk.f32.gmra.mxu0 %vm122_vm0, %v47_v29 }
  0x3f   :  { %1796 = vmatmul.msk.f32.gmra.mxu1 %vm122_vm0, %v57_v30 }
  0x40   :  { %1810 = vmatmul.msk.f32.gmra.mxu2 %vm122_vm0, %v71_v31  ;;  %1823 = vmatmul.msk.f32.gmra.mxu3 %vm122_vm0, %v84_v32 }
  0x42   :  { %1787 = vmatmul.msk.f32.gmra.mxu0 %vm122_vm0, %v48_v33 }
  0x47   :  { %1797 = vmatmul.msk.f32.gmra.mxu1 %vm122_vm0, %v58_v34 }
  0x48   :  { %1811 = vmatmul.msk.f32.gmra.mxu2 %vm122_vm0, %v72_v35  ;;  %1824 = vmatmul.msk.f32.gmra.mxu3 %vm122_vm0, %v85_v36 }
  0x4a   :  { %1788 = vmatmul.msk.f32.gmra.mxu0 %vm122_vm0, %v49_v37 }
  0x4f   :  { %1798 = vmatmul.msk.f32.gmra.mxu1 %vm122_vm0, %v59_v38 }
  0x50   :  { %1812 = vmatmul.msk.f32.gmra.mxu2 %vm122_vm0, %v73_v39  ;;  %1825 = vmatmul.msk.f32.gmra.mxu3 %vm122_vm0, %v86_v40 }
  0x57   :  { %1799 = vmatmul.msk.f32.gmra.mxu1 %vm122_vm0, %v60_v41 }
  0x58   :  { %1813 = vmatmul.msk.f32.gmra.mxu2 %vm122_vm0, %v74_v42  ;;  %1826 = vmatmul.msk.f32.gmra.mxu3 %vm122_vm0, %v87_v43 }
  0x5f   :  { %1800 = vmatmul.msk.f32.gmra.mxu1 %vm122_vm0, %v61_v44 }
  0x60   :  { %1814 = vmatmul.msk.f32.gmra.mxu2 %vm122_vm0, %v75_v45  ;;  %1827 = vmatmul.msk.f32.gmra.mxu3 %vm122_vm0, %v88_v46 }
  0x67   :  { %1801 = vmatmul.msk.f32.gmra.mxu1 %vm122_vm0, %v62_v47 }
  0x68   :  { %1815 = vmatmul.msk.f32.gmra.mxu2 %vm122_vm0, %v76_v48  ;;  %1828 = vmatmul.msk.f32.gmra.mxu3 %vm122_vm0, %v89_v49 }
  0x6f   :  { %1802 = vmatmul.msk.f32.gmra.mxu1 %vm122_vm0, %v63_v50 }
  0x84   :  { %v308_v51 = vpop.f32.mrf.mxu1 }
  0x87   :  { %v118_v52 = vpop.f32.mrf.mxu0 }
  0x88   :  { %v2543_v13 = vperm.slane %v118_v52, 0 }
  0x8a   :  { %v309_v29 = vadd.f32 %v308_v51, %v2543_v13 }
  0x8b   :  { %v2519_v53 = vpop.f32.mrf.mxu2  ;;  %v2521_v54 = vpop.f32.mrf.mxu3 }
  0x8c   :  { %v311_v55 = vpop.f32.mrf.mxu1 }
  0x8d   :  { %v312_v30 = vadd.f32 %v311_v55, %v2543_v13 }
  0x8f   :  { %v2523_v56 = vpop.f32.mrf.mxu0  ;;  %v528_v36 = vpack.c.bf16 %v312_v30, %v309_v29  ;;  %v2169_v29 = vld [vmem:[#allocation2 + $0x20] sm:$0xf0] }
  0x90   :  { %v285_v52 = vadd.f32 %v2523_v56, %v2543_v13 }
  0x93   :  { %v2525_v57 = vpop.f32.mrf.mxu2  ;;  %v2527_v58 = vpop.f32.mrf.mxu3 }
  0x94   :  { %v314_v59 = vpop.f32.mrf.mxu1 }
  0x95   :  { %v315_v23 = vadd.f32 %v314_v59, %v2543_v13 }
  0x97   :  { %v2529_v60 = vpop.f32.mrf.mxu0 }
  0x98   :  { %v288_v55 = vadd.f32 %v2529_v60, %v2543_v13 }
  0x9b   :  { %v2531_v61 = vpop.f32.mrf.mxu2  ;;  %v2533_v62 = vpop.f32.mrf.mxu3 }
  0x9c   :  { %v317_v63 = vpop.f32.mrf.mxu1  ;;  %v357_v60 = vadd.f32 %v2531_v61, %v2543_v13 }
  0x9d   :  { %v318_v24 = vadd.f32 %v317_v63, %v2543_v13 }
  0x9f   :  { %v290_v0 = vpop.f32.mrf.mxu0  ;;  %v529_v31 = vpack.c.bf16 %v318_v24, %v315_v23 }
  0xa0   :  { %v291_v42 = vadd.f32 %v290_v0, %v2543_v13 }
  0xa3   :  { %v2535_v1 = vpop.f32.mrf.mxu2  ;;  %v2537_v2 = vpop.f32.mrf.mxu3 }
  0xa4   :  { %v320_v3 = vpop.f32.mrf.mxu1 }
  0xa5   :  { %v321_v19 = vadd.f32 %v320_v3, %v2543_v13 }
  0xa7   :  { %v293_v4 = vpop.f32.mrf.mxu0 }
  0xa8   :  { %v294_v43 = vadd.f32 %v293_v4, %v2543_v13 }
  0xaa   :  { %v525_v59 = vpack.c.bf16 %v294_v43, %v291_v42 }
  0xab   :  { %v362_v5 = vpop.f32.mrf.mxu2  ;;  %v2539_v6 = vpop.f32.mrf.mxu3 }
  0xac   :  { %v323_v7 = vpop.f32.mrf.mxu1  ;;  %v363_v0 = vadd.f32 %v362_v5, %v2543_v13  ;;  %v351_v5 = vadd.f32 %v2519_v53, %v2543_v13 }
  0xad   :  { %v324_v20 = vadd.f32 %v323_v7, %v2543_v13 }
  0xaf   :  { %v296_v8 = vpop.f32.mrf.mxu0  ;;  %v530_v27 = vpack.c.bf16 %v324_v20, %v321_v19 }
  0xb0   :  { %v297_v41 = vadd.f32 %v296_v8, %v2543_v13  ;;  %v524_v8 = vpack.c.bf16 %v288_v55, %v285_v52  ;;  %v2172_v52 = vld [vmem:[#allocation2 + $0x38] sm:$0xf0]  ;;  %v396_v55 = vadd.f32 %v2533_v62, %v2543_v13 }
  0xb3   :  { %v365_v9 = vpop.f32.mrf.mxu2  ;;  %v2541_v10 = vpop.f32.mrf.mxu3 }
  0xb4   :  { %v326_v11 = vpop.f32.mrf.mxu1  ;;  %v366_v3 = vadd.f32 %v365_v9, %v2543_v13  ;;  %v354_v9 = vadd.f32 %v2525_v57, %v2543_v13 }
  0xb5   :  { %v327_v17 = vadd.f32 %v326_v11, %v2543_v13 }
  0xb7   :  { %v299_v12 = vpop.f32.mrf.mxu0 }
  0xb8   :  { %v300_v39 = vadd.f32 %v299_v12, %v2543_v13  ;;  %v1831_v12 = vld [vmem:[#allocation2] sm:$0xf] }
  0xba   :  { %v526_v46 = vpack.c.bf16 %v300_v39, %v297_v41 }
  0xbb   :  { %v368_v14 = vpop.f32.mrf.mxu2  ;;  %v2545_v15 = vpop.f32.mrf.mxu3 }
  0xbc   :  { %v329_v16 = vpop.f32.mrf.mxu1  ;;  %v369_v63 = vadd.f32 %v368_v14, %v2543_v13  ;;  %v360_v14 = vadd.f32 %v2535_v1, %v2543_v13 }
  0xbd   :  { %v330_v18 = vadd.f32 %v329_v16, %v2543_v13  ;;  %v2166_v16 = vld [vmem:[#allocation2 + $0x8] sm:$0xf0] }
  0xbe   :  { %v1832_v56 = vor.u32 %v2166_v16, %v1831_v12  ;;  %v2167_v12 = vld [vmem:[#allocation2 + $0x10] sm:$0xf0] }
  0xbf   :  { %v302_v21 = vpop.f32.mrf.mxu0  ;;  %v531_v22 = vpack.c.bf16 %v330_v18, %v327_v17  ;;  %v537_v17 = vpack.c.bf16 %v366_v3, %v363_v0  ;;  %v536_v18 = vpack.c.bf16 %v360_v14, %v357_v60  ;;  %v2168_v3 = vld [vmem:[#allocation2 + $0x1c] sm:$0xf]  ;;  %v1867_v60 = vld [vmem:[#allocation2 + $0x48] sm:$0xf]  ;;  %v2175_v14 = vld [vmem:[#allocation2 + $0x50] sm:$0xf0] }
  0xc0   :  { %v303_v38 = vadd.f32 %v302_v21, %v2543_v13  ;;  %v535_v21 = vpack.c.bf16 %v354_v9, %v351_v5  ;;  %v1857_v5 = vld [vmem:[#allocation2 + $0x3c] sm:$0xf0] }
  0xc1   :  { %936 = vmatpush.bf16.msrb.mxu2 %v531_v22  ;;  %v1851_v9 = vld [vmem:[#allocation2 + $0x20] sm:$0xf] }
  0xc3   :  { %v371_v25 = vpop.f32.mrf.mxu2  ;;  %v2553_v26 = vpop.f32.mrf.mxu3 }
  0xc4   :  { %v2555_v28 = vpop.f32.mrf.mxu1  ;;  %v372_v50 = vadd.f32 %v371_v25, %v2543_v13  ;;  %v1843_v25 = vld [vmem:[#allocation2 + $0x18] sm:$0xf]  ;;  %v411_v42 = vadd.f32 %v2553_v26, %v2543_v13  ;;  %v402_v26 = vadd.f32 %v2539_v6, %v2543_v13 }
  0xc5   :  { %937 = vmatpush.bf16.msrb.mxu2 %v530_v27  ;;  %v333_v43 = vadd.f32 %v2555_v28, %v2543_v13  ;;  %v399_v28 = vadd.f32 %v2537_v2, %v2543_v13  ;;  %v390_v2 = vadd.f32 %v2521_v54, %v2543_v13  ;;  %v2171_v54 = vld [vmem:[#allocation2 + $0x34] sm:$0xf] }
  0xc6   :  { %v538_v4 = vpack.c.bf16 %v372_v50, %v369_v63  ;;  %v393_v63 = vadd.f32 %v2527_v58, %v2543_v13 }
  0xc7   :  { %v305_v32 = vpop.f32.mrf.mxu0 }
  0xc8   :  { %v306_v33 = vadd.f32 %v305_v32, %v2543_v13  ;;  %v542_v6 = vpack.c.bf16 %v396_v55, %v393_v63  ;;  %v2190_v55 = vld [vmem:[#allocation2 + $0xc8] sm:$0xf0] }
  0xc9   :  { %938 = vmatpush.bf16.msrb.mxu2 %v529_v31  ;;  %v1844_v31 = vor.u32 %v2169_v29, %v1843_v25  ;;  %v2181_v29 = vld [vmem:[#allocation2 + $0x80] sm:$0xf0]  ;;  %v2186_v63 = vld [vmem:[#allocation2 + $0xac] sm:$0xf] }
  0xca   :  { %v527_v40 = vpack.c.bf16 %v306_v33, %v303_v38 }
  0xcb   :  { %v374_v34 = vpop.f32.mrf.mxu2  ;;  %v2560_v35 = vpop.f32.mrf.mxu3 }
  0xcc   :  { %v2562_v37 = vpop.f32.mrf.mxu1  ;;  %v375_v47 = vadd.f32 %v374_v34, %v2543_v13  ;;  %v414_v38 = vadd.f32 %v2560_v35, %v2543_v13 }
  0xcd   :  { %939 = vmatpush.bf16.msrb.mxu2 %v528_v36 }
  0xce   :  { %v545_v35 = vpack.c.bf16 %v414_v38, %v411_v42  ;;  %v1903_v38 = vld [vmem:[#allocation2 + $0x90] sm:$0xf]  ;;  %v2180_v42 = vld [vmem:[#allocation2 + $0x7c] sm:$0xf] }
  0xd1   :  { %940 = vmatpush.bf16.msrb.mxu2 %v527_v40  ;;  %v336_v40 = vadd.f32 %v2562_v37, %v2543_v13  ;;  %v405_v37 = vadd.f32 %v2541_v10, %v2543_v13 }
  0xd3   :  { %v377_v44 = vpop.f32.mrf.mxu2  ;;  %v416_v45 = vpop.f32.mrf.mxu3 }
  0xd4   :  { %v378_v48 = vadd.f32 %v377_v44, %v2543_v13  ;;  %v338_v49 = vpop.f32.mrf.mxu1  ;;  %v417_v34 = vadd.f32 %v416_v45, %v2543_v13  ;;  %v2165_v45 = vld [vmem:[#allocation2 + $0x4] sm:$0xf] }
  0xd5   :  { %941 = vmatpush.bf16.msrb.mxu2 %v526_v46  ;;  %v339_v36 = vadd.f32 %v338_v49, %v2543_v13  ;;  %v1833_v46 = vld [vmem:[#allocation2 + $0xc] sm:$0xf0] }
  0xd6   :  { %v539_v51 = vpack.c.bf16 %v378_v48, %v375_v47  ;;  %v408_v47 = vadd.f32 %v2545_v15, %v2543_v13  ;;  %v532_v48 = vpack.c.bf16 %v336_v40, %v333_v43  ;;  %v1836_v49 = vor.u32 %v2165_v45, %v1833_v46  ;;  %v1893_v43 = vld [vmem:[#allocation2 + $0x84] sm:$0xf0]  ;;  %v2179_v45 = vld [vmem:[#allocation2 + $0x70] sm:$0xf0] }
  0xd7   :  { %v1896_v46 = vor.u32 %v2180_v42, %v1893_v43  ;;  %v2195_v43 = vld [vmem:[#allocation2 + $0xf4] sm:$0xf] }
  0xd8   :  { %1065 = vmatpush.bf16.msrb.mxu3 %v539_v51  ;;  %v544_v50 = vpack.c.bf16 %v408_v47, %v405_v37  ;;  %v1855_v51 = vld [vmem:[#allocation2 + $0x30] sm:$0xf] }
  0xd9   :  { %942 = vmatpush.bf16.msrb.mxu2 %v525_v59  ;;  %v1856_v15 = vor.u32 %v2172_v52, %v1855_v51  ;;  %v543_v59 = vpack.c.bf16 %v402_v26, %v399_v28  ;;  %v1905_v26 = vld [vmem:[#allocation2 + $0x9c] sm:$0xf0]  ;;  %v2182_v28 = vld [vmem:[#allocation2 + $0x88] sm:$0xf0] }
  0xdb   :  { %v419_v7 = vpop.f32.mrf.mxu3  ;;  %v380_v22 = vpop.f32.mrf.mxu2 }
  0xdc   :  { %1066 = vmatpush.bf16.msrb.mxu3 %v538_v4  ;;  %v341_v11 = vpop.f32.mrf.mxu1  ;;  %v420_v57 = vadd.f32 %v419_v7, %v2543_v13  ;;  %v1845_v4 = vld [vmem:[#allocation2 + $0x24] sm:$0xf0]  ;;  %v381_v62 = vadd.f32 %v380_v22, %v2543_v13 }
  0xdd   :  { %943 = vmatpush.bf16.msrb.mxu2 %v524_v8  ;;  %v342_v32 = vadd.f32 %v341_v11, %v2543_v13  ;;  %v1839_v11 = vld [vmem:[#allocation2 + $0x8] sm:$0xf]  ;;  %v1848_v58 = vor.u32 %v2168_v3, %v1845_v4 }
  0xde   :  { %v546_v39 = vpack.c.bf16 %v420_v57, %v417_v34 }
  0xdf   :  { %v533_v41 = vpack.c.bf16 %v342_v32, %v339_v36  ;;  %v1875_v32 = vld [vmem:[#allocation2 + $0x50] sm:$0xf] }
  0xe0   :  { %1067 = vmatpush.bf16.msrb.mxu3 %v537_v17  ;;  %944 = vmatmul.bf16.vlgmr.msrb.gmra.mxu2 %v1832_v56  ;;  %v1840_v56 = vor.u32 %v2167_v12, %v1839_v11  ;;  %v1868_v17 = vor.u32 %v2175_v14, %v1867_v60  ;;  %v2188_v60 = vld [vmem:[#allocation2 + $0xb8] sm:$0xf0] }
  0xe3   :  { %v422_v19 = vpop.f32.mrf.mxu3  ;;  %v383_v44 = vpop.f32.mrf.mxu2 }
  0xe4   :  { %1068 = vmatpush.bf16.msrb.mxu3 %v536_v18  ;;  %v344_v20 = vpop.f32.mrf.mxu1  ;;  %v423_v23 = vadd.f32 %v422_v19, %v2543_v13  ;;  %v384_v7 = vadd.f32 %v383_v44, %v2543_v13  ;;  %v2170_v18 = vld [vmem:[#allocation2 + $0x28] sm:$0xf0]  ;;  %v1860_v19 = vor.u32 %v2171_v54, %v1857_v5  ;;  %v1887_v44 = vld [vmem:[#allocation2 + $0x68] sm:$0xf] }
  0xe5   :  { %v345_v27 = vadd.f32 %v344_v20, %v2543_v13  ;;  %v1852_v20 = vor.u32 %v2170_v18, %v1851_v9  ;;  %v1888_v47 = vor.u32 %v2179_v45, %v1887_v44  ;;  %v1951_v18 = vld [vmem:[#allocation2 + $0xf0] sm:$0xf]  ;;  %v1953_v44 = vld [vmem:[#allocation2 + $0xfc] sm:$0xf0] }
  0xe6   :  { %v540_v16 = vpack.c.bf16 %v384_v7, %v381_v62  ;;  %v2193_v62 = vld [vmem:[#allocation2 + $0xe0] sm:$0xf0] }
  0xe8   :  { %1069 = vmatpush.bf16.msrb.mxu3 %v535_v21  ;;  %v2178_v21 = vld [vmem:[#allocation2 + $0x68] sm:$0xf0] }
  0xeb   :  { %v425_v61 = vpop.f32.mrf.mxu3  ;;  %v386_v10 = vpop.f32.mrf.mxu2 }
  0xec   :  { %v426_v1 = vadd.f32 %v425_v61, %v2543_v13  ;;  %v347_v24 = vpop.f32.mrf.mxu1  ;;  %v387_v0 = vadd.f32 %v386_v10, %v2543_v13  ;;  %v2174_v61 = vld [vmem:[#allocation2 + $0x4c] sm:$0xf] }
  0xed   :  { %v348_v53 = vadd.f32 %v347_v24, %v2543_v13  ;;  %v1879_v13 = vld [vmem:[#allocation2 + $0x60] sm:$0xf]  ;;  %v2173_v24 = vld [vmem:[#allocation2 + $0x40] sm:$0xf0] }
  0xee   :  { %v547_v30 = vpack.c.bf16 %v426_v1, %v423_v23  ;;  %v541_v8 = vpack.c.bf16 %v390_v2, %v387_v0  ;;  %v1880_v22 = vor.u32 %v2178_v21, %v1879_v13  ;;  %v1869_v23 = vld [vmem:[#allocation2 + $0x54] sm:$0xf0]  ;;  %v2185_v2 = vld [vmem:[#allocation2 + $0xa0] sm:$0xf0] }
  0xef   :  { %v534_v33 = vpack.c.bf16 %v348_v53, %v345_v27  ;;  %v1863_v1 = vld [vmem:[#allocation2 + $0x38] sm:$0xf]  ;;  %v1872_v25 = vor.u32 %v2174_v61, %v1869_v23  ;;  %v2192_v61 = vld [vmem:[#allocation2 + $0xdc] sm:$0xf]  ;;  %v1941_v23 = vld [vmem:[#allocation2 + $0xe4] sm:$0xf0] }
  0xf0   :  { %1194 = vmatpush.bf16.msra.mxu0 %v547_v30  ;;  %949 = vmatmul.bf16.gmra.mxu2 %v1844_v31  ;;  %v1864_v27 = vor.u32 %v2173_v24, %v1863_v1  ;;  %v1891_v53 = vld [vmem:[#allocation2 + $0x78] sm:$0xf]  ;;  %v2177_v30 = vld [vmem:[#allocation2 + $0x64] sm:$0xf]  ;;  %v1881_v31 = vld [vmem:[#allocation2 + $0x6c] sm:$0xf0] }
  0xf1   :  { %1070 = vmatpush.bf16.msrb.mxu3 %v534_v33  ;;  %v1892_v57 = vor.u32 %v2181_v29, %v1891_v53  ;;  %v2176_v33 = vld [vmem:[#allocation2 + $0x58] sm:$0xf0]  ;;  %v1884_v34 = vor.u32 %v2177_v30, %v1881_v31  ;;  %v1911_v0 = vld [vmem:[#allocation2 + $0x98] sm:$0xf]  ;;  %v1935_v24 = vld [vmem:[#allocation2 + $0xc8] sm:$0xf] }
  0xf2   :  { %v1876_v36 = vor.u32 %v2176_v33, %v1875_v32  ;;  %v1912_v4 = vor.u32 %v2185_v2, %v1911_v0  ;;  %v1963_v30 = vld [vmem:[#allocation2 + $0x108] sm:$0xf]  ;;  %v2199_v32 = vld [vmem:[#allocation2 + $0x110] sm:$0xf0] }
  0xf3   :  { %v1964_v33 = vor.u32 %v2199_v32, %v1963_v30  ;;  %v2200_v30 = vld [vmem:[#allocation2 + $0x118] sm:$0xf0] }
  0xf4   :  { %1195 = vmatpush.bf16.msra.mxu0 %v546_v39  ;;  %v2184_v39 = vld [vmem:[#allocation2 + $0x98] sm:$0xf0] }
  0xf5   :  { %1071 = vmatpush.bf16.msrb.mxu3 %v533_v41  ;;  %v1904_v40 = vor.u32 %v2184_v39, %v1903_v38  ;;  %v1371_v41 = vld [vmem:[%s2984_s6] sm:$0xff] }
  0xf6   :  { %2240 = vmatpush.msrb.mxu1 %v1371_v41 }
  0xf8   :  { %1196 = vmatpush.bf16.msra.mxu0 %v545_v35  ;;  %v1915_v35 = vld [vmem:[#allocation2 + $0xa8] sm:$0xf] }
  0xf9   :  { %1072 = vmatpush.bf16.msrb.mxu3 %v532_v48  ;;  %v2187_v48 = vld [vmem:[#allocation2 + $0xb0] sm:$0xf0] }
  0xfa   :  { %v1916_v37 = vor.u32 %v2187_v48, %v1915_v35  ;;  %v2194_v35 = vld [vmem:[#allocation2 + $0xe8] sm:$0xf0]  ;;  %v1956_v48 = vor.u32 %v2195_v43, %v1953_v44 }
  0xfc   :  { %1197 = vmatpush.bf16.msra.mxu0 %v544_v50  ;;  %1073 = vmatmul.bf16.vlgmr.msrb.gmra.mxu3 %v1836_v49  ;;  %v2183_v49 = vld [vmem:[#allocation2 + $0x94] sm:$0xf]  ;;  %v1899_v50 = vld [vmem:[#allocation2 + $0x80] sm:$0xf] }
  0xfd   :  { %v1908_v51 = vor.u32 %v2183_v49, %v1905_v26  ;;  %v1900_v52 = vor.u32 %v2182_v28, %v1899_v50  ;;  %v1975_v28 = vld [vmem:[#allocation2 + $0x120] sm:$0xf] }
 0x100   :  { %1198 = vmatpush.bf16.msra.mxu0 %v543_v59  ;;  %954 = vmatmul.bf16.gmra.mxu2 %v1856_v15  ;;  %v1927_v15 = vld [vmem:[#allocation2 + $0xc0] sm:$0xf] }
 0x101   :  { %v1928_v59 = vor.u32 %v2190_v55, %v1927_v15 }
 0x104   :  { %1199 = vmatpush.bf16.msra.mxu0 %v542_v6  ;;  %v1917_v6 = vld [vmem:[#allocation2 + $0xb4] sm:$0xf0] }
 0x105   :  { %v1920_v3 = vor.u32 %v2186_v63, %v1917_v6 }
 0x108   :  { %1200 = vmatpush.bf16.msra.mxu0 %v541_v8  ;;  %v1939_v8 = vld [vmem:[#allocation2 + $0xd8] sm:$0xf] }
 0x109   :  { %v1940_v11 = vor.u32 %v2193_v62, %v1939_v8 }
 0x10c   :  { %1201 = vmatpush.bf16.msra.mxu0 %v540_v16  ;;  %1078 = vmatmul.bf16.gmra.mxu3 %v1848_v58  ;;  %v2189_v58 = vld [vmem:[#allocation2 + $0xc4] sm:$0xf]  ;;  %v1929_v16 = vld [vmem:[#allocation2 + $0xcc] sm:$0xf0] }
 0x10d   :  { %v1932_v14 = vor.u32 %v2189_v58, %v1929_v16 }
 0x10f   :  { %1202 = vmatmul.bf16.vlgmr.msra.gmra.mxu0 %v1840_v56  ;;  %v1923_v56 = vld [vmem:[#allocation2 + $0xb0] sm:$0xf] }
 0x110   :  { %959 = vmatmul.bf16.gmra.mxu2 %v1868_v17  ;;  %1531 = vmatpush.msrb.mxu0 %v1371_v41  ;;  %v2626_v17 = vld [vmem:[%s2983_s5] ss:$0 sm:$0xff]  ;;  %v1924_v54 = vor.u32 %v2188_v60, %v1923_v56 }
 0x11c   :  { %1083 = vmatmul.bf16.gmra.mxu3 %v1860_v19  ;;  %v2196_v19 = vld [vmem:[#allocation2 + $0xf8] sm:$0xf0] }
 0x11f   :  { %1207 = vmatmul.bf16.gmra.mxu0 %v1852_v20  ;;  %v1952_v20 = vor.u32 %v2196_v19, %v1951_v18 }
 0x120   :  { %964 = vmatmul.bf16.gmra.mxu2 %v1880_v22 }
 0x12c   :  { %1088 = vmatmul.bf16.gmra.mxu3 %v1872_v25  ;;  %v2191_v25 = vld [vmem:[#allocation2 + $0xd0] sm:$0xf0] }
 0x12d   :  { %v1936_v53 = vor.u32 %v2191_v25, %v1935_v24  ;;  %v2201_v24 = vld [vmem:[#allocation2 + $0x124] sm:$0xf]  ;;  %v1977_v25 = vld [vmem:[#allocation2 + $0x12c] sm:$0xf0] }
 0x12e   :  { %v1980_v32 = vor.u32 %v2201_v24, %v1977_v25 }
 0x12f   :  { %1212 = vmatmul.bf16.gmra.mxu0 %v1864_v27  ;;  %v1944_v27 = vor.u32 %v2192_v61, %v1941_v23 }
 0x130   :  { %969 = vmatmul.bf16.gmra.mxu2 %v1892_v57 }
 0x13c   :  { %1093 = vmatmul.bf16.gmra.mxu3 %v1884_v34 }
 0x13f   :  { %1217 = vmatmul.bf16.gmra.mxu0 %v1876_v36 }
 0x140   :  { %974 = vmatmul.bf16.gmra.mxu2 %v1904_v40 }
 0x14c   :  { %1098 = vmatmul.bf16.gmra.mxu3 %v1896_v46 }
 0x14f   :  { %1222 = vmatmul.bf16.gmra.mxu0 %v1888_v47  ;;  %v1947_v47 = vld [vmem:[#allocation2 + $0xe0] sm:$0xf] }
 0x150   :  { %979 = vmatmul.bf16.gmra.mxu2 %v1916_v37  ;;  %v1948_v49 = vor.u32 %v2194_v35, %v1947_v47 }
 0x15c   :  { %1103 = vmatmul.bf16.gmra.mxu3 %v1908_v51 }
 0x15f   :  { %1227 = vmatmul.bf16.gmra.mxu0 %v1900_v52  ;;  %v2202_v52 = vld [vmem:[#allocation2 + $0x128] sm:$0xf0] }
 0x160   :  { %984 = vmatmul.bf16.gmra.mxu2 %v1928_v59  ;;  %v1976_v15 = vor.u32 %v2202_v52, %v1975_v28  ;;  %v2203_v52 = vld [vmem:[#allocation2 + $0x130] sm:$0xf0] }
 0x163   :  { %v945_v10 = vpop.f32.mrf.mxu2 }
 0x164   :  { %v946_v9 = vadd.f32 %v2626_v17, %v945_v10 }
 0x16b   :  { %v947_v7 = vpop.f32.mrf.mxu2 }
 0x16c   :  { %1108 = vmatmul.bf16.gmra.mxu3 %v1920_v3  ;;  %v948_v34 = vadd.f32 %v2626_v17, %v947_v7  ;;  %v1965_v7 = vld [vmem:[#allocation2 + $0x114] sm:$0xf0] }
 0x16f   :  { %1232 = vmatmul.bf16.gmra.mxu0 %v1912_v4  ;;  %v2198_v4 = vld [vmem:[#allocation2 + $0x10c] sm:$0xf] }
 0x170   :  { %989 = vmatmul.bf16.gmra.mxu2 %v1940_v11  ;;  %v1959_v11 = vld [vmem:[#allocation2 + $0xf8] sm:$0xf]  ;;  %v1968_v58 = vor.u32 %v2198_v4, %v1965_v7 }
 0x173   :  { %v950_v12 = vpop.f32.mrf.mxu2 }
 0x174   :  { %v951_v42 = vadd.f32 %v2626_v17, %v950_v12  ;;  %v2197_v12 = vld [vmem:[#allocation2 + $0x100] sm:$0xf0] }
 0x175   :  { %v1960_v56 = vor.u32 %v2197_v12, %v1959_v11 }
 0x17b   :  { %v952_v5 = vpop.f32.mrf.mxu2 }
 0x17c   :  { %1113 = vmatmul.bf16.gmra.mxu3 %v1932_v14  ;;  %v953_v59 = vadd.f32 %v2626_v17, %v952_v5 }
 0x17f   :  { %1237 = vmatmul.bf16.gmra.mxu0 %v1924_v54  ;;  %v1074_v13 = vpop.f32.mrf.mxu3  ;;  %v1987_v54 = vld [vmem:[#allocation2 + $0x138] sm:$0xf] }
 0x180   :  { %v1075_v21 = vadd.f32 %v1074_v13, %v946_v9  ;;  %994 = vmatmul.bf16.gmra.mxu2 %v1952_v20  ;;  %v2205_v9 = vld [vmem:[#allocation2 + $0x140] sm:$0xf0] }
 0x181   :  { %v1988_v18 = vor.u32 %v2205_v9, %v1987_v54  ;;  %v2206_v9 = vld [vmem:[#allocation2 + $0x148] sm:$0xf0] }
 0x183   :  { %v955_v22 = vpop.f32.mrf.mxu2 }
 0x184   :  { %v956_v3 = vadd.f32 %v2626_v17, %v955_v22 }
 0x187   :  { %v1076_v1 = vpop.f32.mrf.mxu3 }
 0x188   :  { %v1077_v38 = vadd.f32 %v1076_v1, %v948_v34 }
 0x18b   :  { %v2629_v29 = vpop.f32.mrf.mxu2 }
 0x18c   :  { %v1203_v57 = vpop.f32.mrf.mxu0  ;;  %1118 = vmatmul.bf16.gmra.mxu3 %v1944_v27  ;;  %v958_v20 = vadd.f32 %v2626_v17, %v2629_v29 }
 0x18d   :  { %v2631_v31 = vadd.f32 %v1203_v57, %v1075_v21  ;;  %v1971_v57 = vld [vmem:[#allocation2 + $0x110] sm:$0xf] }
 0x18f   :  { %1242 = vmatmul.bf16.gmra.mxu0 %v1936_v53  ;;  %v1079_v36 = vpop.f32.mrf.mxu3 }
 0x190   :  { %999 = vmatmul.bf16.gmra.mxu2 %v1964_v33  ;;  %v1080_v37 = vadd.f32 %v1079_v36, %v951_v42  ;;  %v1972_v33 = vor.u32 %v2200_v30, %v1971_v57 }
 0x193   :  { %v960_v39 = vpop.f32.mrf.mxu2 }
 0x194   :  { %v1205_v40 = vpop.f32.mrf.mxu0  ;;  %v961_v1 = vadd.f32 %v2626_v17, %v960_v39 }
 0x195   :  { %v1206_v41 = vadd.f32 %v1205_v40, %v1077_v38  ;;  %v1999_v38 = vld [vmem:[#allocation2 + $0x150] sm:$0xf] }
 0x197   :  { %v1324_v45 = vmax.f32 %v1206_v41, 0.0  ;;  %v1081_v46 = vpop.f32.mrf.mxu3  ;;  %v2208_v41 = vld [vmem:[#allocation2 + $0x158] sm:$0xf0] }
 0x198   :  { %v1082_v63 = vadd.f32 %v1081_v46, %v953_v59  ;;  %v2000_v42 = vor.u32 %v2208_v41, %v1999_v38  ;;  %v2209_v41 = vld [vmem:[#allocation2 + $0x160] sm:$0xf0] }
 0x199   :  { %2118 = vmatmul.msk.f32.vlgmr.msrb.gmra.mxu1 %vm122_vm0, %v1324_v45 }
 0x19b   :  { %v2636_v26 = vpop.f32.mrf.mxu2 }
 0x19c   :  { %v1208_v50 = vpop.f32.mrf.mxu0  ;;  %1123 = vmatmul.bf16.gmra.mxu3 %v1956_v48  ;;  %v963_v43 = vadd.f32 %v2626_v17, %v2636_v26 }
 0x19d   :  { %v1209_v51 = vadd.f32 %v1208_v50, %v1080_v37  ;;  %v2204_v37 = vld [vmem:[#allocation2 + $0x13c] sm:$0xf] }
 0x19f   :  { %1247 = vmatmul.bf16.gmra.mxu0 %v1948_v49  ;;  %v1325_v55 = vmax.f32 %v1209_v51, 0.0  ;;  %v1084_v10 = vpop.f32.mrf.mxu3  ;;  %v1989_v49 = vld [vmem:[#allocation2 + $0x144] sm:$0xf0] }
 0x1a0   :  { %1004 = vmatmul.bf16.gmra.mxu2 %v1976_v15  ;;  %v1085_v16 = vadd.f32 %v1084_v10, %v956_v3  ;;  %v1983_v51 = vld [vmem:[#allocation2 + $0x128] sm:$0xf]  ;;  %v1992_v15 = vor.u32 %v2204_v37, %v1989_v49 }
 0x1a1   :  { %2119 = vmatmul.msk.f32.gmra.mxu1 %vm122_vm0, %v1325_v55  ;;  %v1984_v55 = vor.u32 %v2203_v52, %v1983_v51 }
 0x1a3   :  { %v965_v6 = vpop.f32.mrf.mxu2 }
 0x1a4   :  { %v1210_v0 = vpop.f32.mrf.mxu0  ;;  %v966_v48 = vadd.f32 %v2626_v17, %v965_v6 }
 0x1a5   :  { %v1211_v2 = vadd.f32 %v1210_v0, %v1082_v63  ;;  %v2011_v63 = vld [vmem:[#allocation2 + $0x168] sm:$0xf] }
 0x1a7   :  { %v1326_v8 = vmax.f32 %v1211_v2, 0.0  ;;  %v1086_v62 = vpop.f32.mrf.mxu3  ;;  %v2211_v2 = vld [vmem:[#allocation2 + $0x170] sm:$0xf0] }
 0x1a8   :  { %v1087_v21 = vadd.f32 %v1086_v62, %v958_v20  ;;  %v2012_v3 = vor.u32 %v2211_v2, %v2011_v63  ;;  %v2212_v2 = vld [vmem:[#allocation2 + $0x178] sm:$0xf0] }
 0x1a9   :  { %2120 = vmatmul.msk.f32.gmra.mxu1 %vm122_vm0, %v1326_v8 }
 0x1ab   :  { %v2642_v60 = vpop.f32.mrf.mxu2 }
 0x1ac   :  { %v1213_v14 = vpop.f32.mrf.mxu0  ;;  %1128 = vmatmul.bf16.gmra.mxu3 %v1968_v58  ;;  %v968_v4 = vadd.f32 %v2626_v17, %v2642_v60 }
 0x1ad   :  { %v1214_v5 = vadd.f32 %v1213_v14, %v1085_v16  ;;  %v2207_v16 = vld [vmem:[#allocation2 + $0x154] sm:$0xf] }
 0x1af   :  { %1252 = vmatmul.bf16.gmra.mxu0 %v1960_v56  ;;  %v1327_v19 = vmax.f32 %v1214_v5, 0.0  ;;  %v1089_v13 = vpop.f32.mrf.mxu3  ;;  %v2001_v56 = vld [vmem:[#allocation2 + $0x15c] sm:$0xf0] }
 0x1b0   :  { %1009 = vmatmul.bf16.gmra.mxu2 %v1988_v18  ;;  %v1090_v29 = vadd.f32 %v1089_v13, %v961_v1  ;;  %v1995_v5 = vld [vmem:[#allocation2 + $0x140] sm:$0xf]  ;;  %v2004_v18 = vor.u32 %v2207_v16, %v2001_v56 }
 0x1b1   :  { %2121 = vmatmul.msk.f32.gmra.mxu1 %vm122_vm0, %v1327_v19  ;;  %v1996_v19 = vor.u32 %v2206_v9, %v1995_v5 }
 0x1b3   :  { %v970_v22 = vpop.f32.mrf.mxu2 }
 0x1b4   :  { %v1215_v61 = vpop.f32.mrf.mxu0  ;;  %v971_v58 = vadd.f32 %v2626_v17, %v970_v22 }
 0x1b5   :  { %v1216_v23 = vadd.f32 %v1215_v61, %v1087_v21  ;;  %v2023_v21 = vld [vmem:[#allocation2 + $0x180] sm:$0xf] }
 0x1b7   :  { %v1328_v27 = vmax.f32 %v1216_v23, 0.0  ;;  %v1091_v53 = vpop.f32.mrf.mxu3  ;;  %v2214_v23 = vld [vmem:[#allocation2 + $0x188] sm:$0xf0] }
 0x1b8   :  { %v1092_v45 = vadd.f32 %v1091_v53, %v963_v43  ;;  %v2024_v1 = vor.u32 %v2214_v23, %v2023_v21  ;;  %v2215_v23 = vld [vmem:[#allocation2 + $0x190] sm:$0xf0] }
 0x1b9   :  { %2122 = vmatmul.msk.f32.gmra.mxu1 %vm122_vm0, %v1328_v27 }
 0x1bb   :  { %v2649_v34 = vpop.f32.mrf.mxu2 }
 0x1bc   :  { %v1218_v36 = vpop.f32.mrf.mxu0  ;;  %1133 = vmatmul.bf16.gmra.mxu3 %v1980_v32  ;;  %v973_v24 = vadd.f32 %v2626_v17, %v2649_v34 }
 0x1bd   :  { %v1219_v40 = vadd.f32 %v1218_v36, %v1090_v29  ;;  %v2210_v29 = vld [vmem:[#allocation2 + $0x16c] sm:$0xf] }
 0x1bf   :  { %1257 = vmatmul.bf16.gmra.mxu0 %v1972_v33  ;;  %v1329_v39 = vmax.f32 %v1219_v40, 0.0  ;;  %v1094_v44 = vpop.f32.mrf.mxu3  ;;  %v2013_v33 = vld [vmem:[#allocation2 + $0x174] sm:$0xf0] }
 0x1c0   :  { %1014 = vmatmul.bf16.gmra.mxu2 %v2000_v42  ;;  %v1095_v26 = vadd.f32 %v1094_v44, %v966_v48  ;;  %v2007_v40 = vld [vmem:[#allocation2 + $0x158] sm:$0xf]  ;;  %v2016_v42 = vor.u32 %v2210_v29, %v2013_v33 }
 0x1c1   :  { %2123 = vmatmul.msk.f32.gmra.mxu1 %vm122_vm0, %v1329_v39  ;;  %v2008_v39 = vor.u32 %v2209_v41, %v2007_v40 }
 0x1c3   :  { %v975_v46 = vpop.f32.mrf.mxu2 }
 0x1c4   :  { %v1220_v47 = vpop.f32.mrf.mxu0  ;;  %v976_v32 = vadd.f32 %v2626_v17, %v975_v46 }
 0x1c5   :  { %v1221_v35 = vadd.f32 %v1220_v47, %v1092_v45  ;;  %v2035_v45 = vld [vmem:[#allocation2 + $0x198] sm:$0xf] }
 0x1c7   :  { %v1330_v50 = vmax.f32 %v1221_v35, 0.0  ;;  %v1096_v28 = vpop.f32.mrf.mxu3  ;;  %v2217_v35 = vld [vmem:[#allocation2 + $0x1a0] sm:$0xf0] }
 0x1c8   :  { %v1097_v8 = vadd.f32 %v1096_v28, %v968_v4  ;;  %v2036_v48 = vor.u32 %v2217_v35, %v2035_v45 }
 0x1c9   :  { %2124 = vmatmul.msk.f32.gmra.mxu1 %vm122_vm0, %v1330_v50 }
 0x1cb   :  { %v2656_v59 = vpop.f32.mrf.mxu2 }
 0x1cc   :  { %v1223_v10 = vpop.f32.mrf.mxu0  ;;  %1138 = vmatmul.bf16.gmra.mxu3 %v1992_v15  ;;  %v978_v37 = vadd.f32 %v2626_v17, %v2656_v59 }
 0x1cd   :  { %v1224_v0 = vadd.f32 %v1223_v10, %v1095_v26  ;;  %v2213_v26 = vld [vmem:[#allocation2 + $0x184] sm:$0xf] }
 0x1cf   :  { %1262 = vmatmul.bf16.gmra.mxu0 %v1984_v55  ;;  %v1331_v6 = vmax.f32 %v1224_v0, 0.0  ;;  %v1099_v7 = vpop.f32.mrf.mxu3  ;;  %v2025_v55 = vld [vmem:[#allocation2 + $0x18c] sm:$0xf0] }
 0x1d0   :  { %1019 = vmatmul.bf16.gmra.mxu2 %v2012_v3  ;;  %v1100_v60 = vadd.f32 %v1099_v7, %v971_v58  ;;  %v2019_v0 = vld [vmem:[#allocation2 + $0x170] sm:$0xf]  ;;  %v2028_v3 = vor.u32 %v2213_v26, %v2025_v55 }
 0x1d1   :  { %2125 = vmatmul.msk.f32.gmra.mxu1 %vm122_vm0, %v1331_v6  ;;  %v2020_v6 = vor.u32 %v2212_v2, %v2019_v0 }
 0x1d3   :  { %v980_v62 = vpop.f32.mrf.mxu2 }
 0x1d4   :  { %v1225_v11 = vpop.f32.mrf.mxu0  ;;  %v981_v15 = vadd.f32 %v2626_v17, %v980_v62 }
 0x1d5   :  { %v1226_v12 = vadd.f32 %v1225_v11, %v1097_v8  ;;  %v2047_v8 = vld [vmem:[#allocation2 + $0x1b0] sm:$0xf] }
 0x1d7   :  { %v1332_v14 = vmax.f32 %v1226_v12, 0.0  ;;  %v1101_v54 = vpop.f32.mrf.mxu3  ;;  %v2220_v12 = vld [vmem:[#allocation2 + $0x1b8] sm:$0xf0] }
 0x1d8   :  { %v1102_v27 = vadd.f32 %v1101_v54, %v973_v24  ;;  %v2048_v58 = vor.u32 %v2220_v12, %v2047_v8  ;;  %v2061_v12 = vld [vmem:[#allocation2 + $0x1d4] sm:$0xf0] }
 0x1d9   :  { %2126 = vmatmul.msk.f32.gmra.mxu1 %vm122_vm0, %v1332_v14 }
 0x1db   :  { %v2663_v20 = vpop.f32.mrf.mxu2 }
 0x1dc   :  { %v1228_v13 = vpop.f32.mrf.mxu0  ;;  %1143 = vmatmul.bf16.gmra.mxu3 %v2004_v18  ;;  %v983_v16 = vadd.f32 %v2626_v17, %v2663_v20 }
 0x1dd   :  { %v1229_v61 = vadd.f32 %v1228_v13, %v1100_v60  ;;  %v2216_v60 = vld [vmem:[#allocation2 + $0x19c] sm:$0xf] }
 0x1df   :  { %1267 = vmatmul.bf16.gmra.mxu0 %v1996_v19  ;;  %v1333_v22 = vmax.f32 %v1229_v61, 0.0  ;;  %v1104_v25 = vpop.f32.mrf.mxu3  ;;  %v2037_v19 = vld [vmem:[#allocation2 + $0x1a4] sm:$0xf0] }
 0x1e0   :  { %1024 = vmatmul.bf16.gmra.mxu2 %v2024_v1  ;;  %v1105_v34 = vadd.f32 %v1104_v25, %v976_v32  ;;  %v2031_v61 = vld [vmem:[#allocation2 + $0x188] sm:$0xf]  ;;  %v2040_v1 = vor.u32 %v2216_v60, %v2037_v19  ;;  %v2083_v19 = vld [vmem:[#allocation2 + $0x1f8] sm:$0xf] }
 0x1e1   :  { %2127 = vmatmul.msk.f32.gmra.mxu1 %vm122_vm0, %v1333_v22  ;;  %v2032_v22 = vor.u32 %v2215_v23, %v2031_v61 }
 0x1e3   :  { %v985_v53 = vpop.f32.mrf.mxu2 }
 0x1e4   :  { %v1230_v57 = vpop.f32.mrf.mxu0  ;;  %v986_v18 = vadd.f32 %v2626_v17, %v985_v53 }
 0x1e5   :  { %v1231_v30 = vadd.f32 %v1230_v57, %v1102_v27  ;;  %v2059_v27 = vld [vmem:[#allocation2 + $0x1c8] sm:$0xf] }
 0x1e7   :  { %v1334_v36 = vmax.f32 %v1231_v30, 0.0  ;;  %v1106_v38 = vpop.f32.mrf.mxu3  ;;  %v2223_v30 = vld [vmem:[#allocation2 + $0x1d0] sm:$0xf0] }
 0x1e8   :  { %v1107_v50 = vadd.f32 %v1106_v38, %v978_v37  ;;  %v2060_v32 = vor.u32 %v2223_v30, %v2059_v27 }
 0x1e9   :  { %2128 = vmatmul.msk.f32.gmra.mxu1 %vm122_vm0, %v1334_v36 }
 0x1eb   :  { %v2670_v43 = vpop.f32.mrf.mxu2 }
 0x1ec   :  { %v1233_v44 = vpop.f32.mrf.mxu0  ;;  %1148 = vmatmul.bf16.gmra.mxu3 %v2016_v42  ;;  %v988_v29 = vadd.f32 %v2626_v17, %v2670_v43  ;;  %v2218_v43 = vld [vmem:[#allocation2 + $0x1a8] sm:$0xf0] }
 0x1ed   :  { %v1234_v47 = vadd.f32 %v1233_v44, %v1105_v34  ;;  %v2219_v34 = vld [vmem:[#allocation2 + $0x1b4] sm:$0xf] }
 0x1ef   :  { %1272 = vmatmul.bf16.gmra.mxu0 %v2008_v39  ;;  %v1335_v46 = vmax.f32 %v1234_v47, 0.0  ;;  %v1109_v49 = vpop.f32.mrf.mxu3  ;;  %v2049_v39 = vld [vmem:[#allocation2 + $0x1bc] sm:$0xf0] }
 0x1f0   :  { %1029 = vmatmul.bf16.gmra.mxu2 %v2036_v48  ;;  %v1110_v59 = vadd.f32 %v1109_v49, %v981_v15  ;;  %v2043_v48 = vld [vmem:[#allocation2 + $0x1a0] sm:$0xf]  ;;  %v2226_v15 = vld [vmem:[#allocation2 + $0x1e8] sm:$0xf0] }
 0x1f1   :  { %2129 = vmatmul.msk.f32.gmra.mxu1 %vm122_vm0, %v1335_v46  ;;  %v2052_v46 = vor.u32 %v2219_v34, %v2049_v39  ;;  %v2044_v49 = vor.u32 %v2218_v43, %v2043_v48  ;;  %v2224_v34 = vld [vmem:[#allocation2 + $0x1d8] sm:$0xf0] }
 0x1f2   :  { %v2232_v43 = vld [vmem:[#allocation2 + $0x218] sm:$0xf0] }
 0x1f3   :  { %v990_v28 = vpop.f32.mrf.mxu2 }
 0x1f4   :  { %v1235_v51 = vpop.f32.mrf.mxu0  ;;  %v991_v42 = vadd.f32 %v2626_v17, %v990_v28 }
 0x1f5   :  { %v1236_v52 = vadd.f32 %v1235_v51, %v1107_v50  ;;  %v2071_v51 = vld [vmem:[#allocation2 + $0x1e0] sm:$0xf] }
 0x1f6   :  { %v2072_v55 = vor.u32 %v2226_v15, %v2071_v51 }
 0x1f7   :  { %v1336_v10 = vmax.f32 %v1236_v52, 0.0  ;;  %v1111_v63 = vpop.f32.mrf.mxu3 }
 0x1f8   :  { %v1112_v14 = vadd.f32 %v1111_v63, %v983_v16 }
 0x1f9   :  { %2130 = vmatmul.msk.f32.gmra.mxu1 %vm122_vm0, %v1336_v10 }
 0x1fb   :  { %v2677_v4 = vpop.f32.mrf.mxu2 }
 0x1fc   :  { %v1238_v7 = vpop.f32.mrf.mxu0  ;;  %1153 = vmatmul.bf16.gmra.mxu3 %v2028_v3  ;;  %v993_v0 = vadd.f32 %v2626_v17, %v2677_v4 }
 0x1fd   :  { %v1239_v11 = vadd.f32 %v1238_v7, %v1110_v59 }
 0x1ff   :  { %1277 = vmatmul.bf16.gmra.mxu0 %v2020_v6  ;;  %v1337_v62 = vmax.f32 %v1239_v11, 0.0  ;;  %v1114_v56 = vpop.f32.mrf.mxu3  ;;  %v2222_v11 = vld [vmem:[#allocation2 + $0x1cc] sm:$0xf] }
 0x200   :  { %1034 = vmatmul.bf16.gmra.mxu2 %v2048_v58  ;;  %v1115_v20 = vadd.f32 %v1114_v56, %v986_v18  ;;  %v2055_v56 = vld [vmem:[#allocation2 + $0x1b8] sm:$0xf] }
 0x201   :  { %2131 = vmatmul.msk.f32.gmra.mxu1 %vm122_vm0, %v1337_v62 }
 0x203   :  { %v2682_v54 = vpop.f32.mrf.mxu2 }
 0x204   :  { %v1240_v5 = vpop.f32.mrf.mxu0  ;;  %v996_v8 = vadd.f32 %v2626_v17, %v2682_v54 }
 0x205   :  { %v1241_v9 = vadd.f32 %v1240_v5, %v1112_v14  ;;  %v2221_v14 = vld [vmem:[#allocation2 + $0x1c0] sm:$0xf0]  ;;  %v2064_v5 = vor.u32 %v2222_v11, %v2061_v12  ;;  %v2227_v11 = vld [vmem:[#allocation2 + $0x1f0] sm:$0xf0] }
 0x206   :  { %v2056_v18 = vor.u32 %v2221_v14, %v2055_v56  ;;  %v2235_v14 = vld [vmem:[#allocation2 + $0x230] sm:$0xf0] }
 0x207   :  { %v1338_v13 = vmax.f32 %v1241_v9, 0.0  ;;  %v1116_v21 = vpop.f32.mrf.mxu3 }
 0x208   :  { %v1117_v36 = vadd.f32 %v1116_v21, %v988_v29  ;;  %v2229_v21 = vld [vmem:[#allocation2 + $0x200] sm:$0xf0] }
 0x209   :  { %2132 = vmatmul.msk.f32.gmra.mxu1 %vm122_vm0, %v1338_v13  ;;  %v2084_v23 = vor.u32 %v2229_v21, %v2083_v19  ;;  %v2225_v29 = vld [vmem:[#allocation2 + $0x1e4] sm:$0xf] }
 0x20b   :  { %v2686_v24 = vpop.f32.mrf.mxu2 }
 0x20c   :  { %v1243_v25 = vpop.f32.mrf.mxu0  ;;  %1158 = vmatmul.bf16.gmra.mxu3 %v2040_v1 }
 0x20d   :  { %v1244_v57 = vadd.f32 %v1243_v25, %v1115_v20 }
 0x20f   :  { %1282 = vmatmul.bf16.gmra.mxu0 %v2032_v22  ;;  %v1339_v53 = vmax.f32 %v1244_v57, 0.0  ;;  %v1119_v33 = vpop.f32.mrf.mxu3  ;;  %v998_v22 = vadd.f32 %v2626_v17, %v2686_v24 }
 0x210   :  { %1039 = vmatmul.bf16.gmra.mxu2 %v2060_v32  ;;  %v1120_v37 = vadd.f32 %v1119_v33, %v991_v42  ;;  %v2073_v33 = vld [vmem:[#allocation2 + $0x1ec] sm:$0xf0] }
 0x211   :  { %2133 = vmatmul.msk.f32.gmra.mxu1 %vm122_vm0, %v1339_v53  ;;  %v2067_v42 = vld [vmem:[#allocation2 + $0x1d0] sm:$0xf]  ;;  %v2076_v39 = vor.u32 %v2225_v29, %v2073_v33  ;;  %v2230_v29 = vld [vmem:[#allocation2 + $0x208] sm:$0xf0] }
 0x213   :  { %v2691_v38 = vpop.f32.mrf.mxu2 }
 0x214   :  { %v1245_v40 = vpop.f32.mrf.mxu0  ;;  %v1001_v53 = vadd.f32 %v2626_v17, %v2691_v38 }
 0x215   :  { %v1246_v41 = vadd.f32 %v1245_v40, %v1117_v36 }
 0x216   :  { %v1536_v44 = vpop.f32.mrf.mxu1 }
 0x217   :  { %v1340_v45 = vmax.f32 %v1246_v41, 0.0  ;;  %v1678_v47 = vpack.c.bf16 %v1536_v44, %v1536_v44  ;;  %v1121_v35 = vpop.f32.mrf.mxu3 }
 0x218   :  { %v1122_v3 = vadd.f32 %v1121_v35, %v993_v0  ;;  %v2095_v35 = vld [vmem:[#allocation2 + $0x210] sm:$0xf]  ;;  %v2228_v0 = vld [vmem:[#allocation2 + $0x1fc] sm:$0xf] }
 0x219   :  { %1727 = vst.msk [vmem:[%s2985_s7 + $0x4] sm:$0xf] %vm1725_vm3, %v1678_v47  ;;  %2134 = vmatmul.msk.f32.gmra.mxu1 %vm122_vm0, %v1340_v45  ;;  %v2068_v45 = vor.u32 %v2224_v34, %v2067_v42 }
 0x21b   :  { %v2699_v50 = vpop.f32.mrf.mxu2 }
 0x21c   :  { %v1248_v28 = vpop.f32.mrf.mxu0  ;;  %1163 = vmatmul.bf16.gmra.mxu3 %v2052_v46  ;;  %v1003_v51 = vadd.f32 %v2626_v17, %v2699_v50 }
 0x21d   :  { %v1249_v52 = vadd.f32 %v1248_v28, %v1120_v37  ;;  %v2096_v37 = vor.u32 %v2232_v43, %v2095_v35 }
 0x21e   :  { %v1539_v26 = vpop.f32.mrf.mxu1 }
 0x21f   :  { %1287 = vmatmul.bf16.gmra.mxu0 %v2044_v49  ;;  %v1341_v10 = vmax.f32 %v1249_v52, 0.0  ;;  %v1679_v63 = vpack.c.bf16 %v1539_v26, %v1539_v26  ;;  %v1124_v2 = vpop.f32.mrf.mxu3 }
 0x220   :  { %1044 = vmatmul.bf16.gmra.mxu2 %v2072_v55  ;;  %v1125_v9 = vadd.f32 %v1124_v2, %v996_v8  ;;  %v2085_v2 = vld [vmem:[#allocation2 + $0x204] sm:$0xf0] }
 0x221   :  { %1728 = vst.msk [vmem:[%s2985_s7 + $0x8] sm:$0xf] %vm1725_vm3, %v1679_v63  ;;  %2135 = vmatmul.msk.f32.gmra.mxu1 %vm122_vm0, %v1341_v10  ;;  %v2079_v8 = vld [vmem:[#allocation2 + $0x1e8] sm:$0xf]  ;;  %v2088_v12 = vor.u32 %v2228_v0, %v2085_v2 }
 0x223   :  { %v2708_v59 = vpop.f32.mrf.mxu2 }
 0x224   :  { %v1250_v6 = vpop.f32.mrf.mxu0  ;;  %v1006_v63 = vadd.f32 %v2626_v17, %v2708_v59 }
 0x225   :  { %v1251_v7 = vadd.f32 %v1250_v6, %v1122_v3 }
 0x226   :  { %v1542_v4 = vpop.f32.mrf.mxu1 }
 0x227   :  { %v1342_v58 = vmax.f32 %v1251_v7, 0.0  ;;  %v1680_v62 = vpack.c.bf16 %v1542_v4, %v1542_v4  ;;  %v1126_v16 = vpop.f32.mrf.mxu3 }
 0x228   :  { %v1127_v27 = vadd.f32 %v1126_v16, %v998_v22  ;;  %v2107_v16 = vld [vmem:[#allocation2 + $0x228] sm:$0xf]  ;;  %v2231_v22 = vld [vmem:[#allocation2 + $0x214] sm:$0xf] }
 0x229   :  { %1729 = vst.msk [vmem:[%s2985_s7 + $0xc] sm:$0xf] %vm1725_vm3, %v1680_v62  ;;  %2136 = vmatmul.msk.f32.gmra.mxu1 %vm122_vm0, %v1342_v58  ;;  %v2080_v58 = vor.u32 %v2227_v11, %v2079_v8 }
 0x22b   :  { %v2717_v60 = vpop.f32.mrf.mxu2 }
 0x22c   :  { %v1253_v54 = vpop.f32.mrf.mxu0  ;;  %1168 = vmatmul.bf16.gmra.mxu3 %v2064_v5  ;;  %v1008_v19 = vadd.f32 %v2626_v17, %v2717_v60 }
 0x22d   :  { %v1254_v13 = vadd.f32 %v1253_v54, %v1125_v9  ;;  %v2108_v9 = vor.u32 %v2235_v14, %v2107_v16 }
 0x22e   :  { %v1545_v61 = vpop.f32.mrf.mxu1 }
 0x22f   :  { %1292 = vmatmul.bf16.gmra.mxu0 %v2056_v18  ;;  %v1343_v1 = vmax.f32 %v1254_v13, 0.0  ;;  %v1681_v20 = vpack.c.bf16 %v1545_v61, %v1545_v61  ;;  %v1129_v25 = vpop.f32.mrf.mxu3 }
 0x230   :  { %1049 = vmatmul.bf16.gmra.mxu2 %v2084_v23  ;;  %v1130_v44 = vadd.f32 %v1129_v25, %v1001_v53  ;;  %v2097_v25 = vld [vmem:[#allocation2 + $0x21c] sm:$0xf0] }
 0x231   :  { %1730 = vst.msk [vmem:[%s2985_s7 + $0x10] sm:$0xf] %vm1725_vm3, %v1681_v20  ;;  %2137 = vmatmul.msk.f32.gmra.mxu1 %vm122_vm0, %v1343_v1  ;;  %v2091_v53 = vld [vmem:[#allocation2 + $0x200] sm:$0xf]  ;;  %v2100_v33 = vor.u32 %v2231_v22, %v2097_v25 }
 0x233   :  { %v2726_v57 = vpop.f32.mrf.mxu2 }
 0x234   :  { %v1255_v30 = vpop.f32.mrf.mxu0  ;;  %v1011_v20 = vadd.f32 %v2626_v17, %v2726_v57 }
 0x235   :  { %v1256_v32 = vadd.f32 %v1255_v30, %v1127_v27 }
 0x236   :  { %v1548_v24 = vpop.f32.mrf.mxu1 }
 0x237   :  { %v1344_v36 = vmax.f32 %v1256_v32, 0.0  ;;  %v1682_v40 = vpack.c.bf16 %v1548_v24, %v1548_v24  ;;  %v1131_v41 = vpop.f32.mrf.mxu3 }
 0x238   :  { %v1132_v15 = vadd.f32 %v1131_v41, %v1003_v51 }
 0x239   :  { %1731 = vst.msk [vmem:[%s2985_s7 + $0x14] sm:$0xf] %vm1725_vm3, %v1682_v40  ;;  %2138 = vmatmul.msk.f32.gmra.mxu1 %vm122_vm0, %v1344_v36  ;;  %v2092_v36 = vor.u32 %v2230_v29, %v2091_v53 }
 0x23b   :  { %v2735_v47 = vpop.f32.mrf.mxu2 }
 0x23c   :  { %v1258_v38 = vpop.f32.mrf.mxu0  ;;  %1173 = vmatmul.bf16.gmra.mxu3 %v2076_v39 }
 0x23d   :  { %v1259_v48 = vadd.f32 %v1258_v38, %v1130_v44  ;;  %v1013_v44 = vadd.f32 %v2626_v17, %v2735_v47 }
 0x23e   :  { %v1551_v46 = vpop.f32.mrf.mxu1 }
 0x23f   :  { %1297 = vmatmul.bf16.gmra.mxu0 %v2068_v45  ;;  %v1345_v49 = vmax.f32 %v1259_v48, 0.0  ;;  %v1683_v28 = vpack.c.bf16 %v1551_v46, %v1551_v46  ;;  %v1134_v52 = vpop.f32.mrf.mxu3  ;;  %v2234_v46 = vld [vmem:[#allocation2 + $0x22c] sm:$0xf] }
 0x240   :  { %1054 = vmatmul.bf16.gmra.mxu2 %v2096_v37  ;;  %v1135_v4 = vadd.f32 %v1134_v52, %v1006_v63  ;;  %v2109_v37 = vld [vmem:[#allocation2 + $0x234] sm:$0xf0] }
 0x241   :  { %1732 = vst.msk [vmem:[%s2985_s7 + $0x18] sm:$0xf] %vm1725_vm3, %v1683_v28  ;;  %2139 = vmatmul.msk.f32.gmra.mxu1 %vm122_vm0, %v1345_v49 }
 0x243   :  { %v2744_v26 = vpop.f32.mrf.mxu2 }
 0x244   :  { %v1260_v55 = vpop.f32.mrf.mxu0  ;;  %v1016_v43 = vadd.f32 %v2626_v17, %v2744_v26 }
 0x245   :  { %v1261_v10 = vadd.f32 %v1260_v55, %v1132_v15  ;;  %v2103_v15 = vld [vmem:[#allocation2 + $0x218] sm:$0xf]  ;;  %v2233_v55 = vld [vmem:[#allocation2 + $0x220] sm:$0xf0] }
 0x246   :  { %v1554_v50 = vpop.f32.mrf.mxu1  ;;  %v2104_v0 = vor.u32 %v2233_v55, %v2103_v15 }
 0x247   :  { %v1346_v3 = vmax.f32 %v1261_v10, 0.0  ;;  %v1684_v6 = vpack.c.bf16 %v1554_v50, %v1554_v50  ;;  %v1136_v7 = vpop.f32.mrf.mxu3  ;;  %v2112_v10 = vor.u32 %v2234_v46, %v2109_v37 }
 0x248   :  { %v1137_v21 = vadd.f32 %v1136_v7, %v1008_v19 }
 0x249   :  { %1733 = vst.msk [vmem:[%s2985_s7 + $0x1c] sm:$0xf] %vm1725_vm3, %v1684_v6  ;;  %2140 = vmatmul.msk.f32.gmra.mxu1 %vm122_vm0, %v1346_v3 }
 0x24b   :  { %v2753_v62 = vpop.f32.mrf.mxu2 }
 0x24c   :  { %v1263_v59 = vpop.f32.mrf.mxu0  ;;  %1178 = vmatmul.bf16.gmra.mxu3 %v2088_v12  ;;  %v1018_v7 = vadd.f32 %v2626_v17, %v2753_v62  ;;  %v2236_v62 = vld [vmem:[#allocation2 + $0x238] sm:$0xf0] }
 0x24d   :  { %v1264_v56 = vadd.f32 %v1263_v59, %v1135_v4 }
 0x24e   :  { %v1557_v5 = vpop.f32.mrf.mxu1 }
 0x24f   :  { %1302 = vmatmul.bf16.gmra.mxu0 %v2080_v58  ;;  %v1347_v18 = vmax.f32 %v1264_v56, 0.0  ;;  %v1685_v54 = vpack.c.bf16 %v1557_v5, %v1557_v5  ;;  %v1139_v13 = vpop.f32.mrf.mxu3 }
 0x250   :  { %1059 = vmatmul.bf16.gmra.mxu2 %v2108_v9  ;;  %v1140_v24 = vadd.f32 %v1139_v13, %v1011_v20  ;;  %v2115_v9 = vld [vmem:[#allocation2 + $0x230] sm:$0xf] }
 0x251   :  { %1734 = vst.msk [vmem:[%s2985_s7 + $0x20] sm:$0xf] %vm1725_vm3, %v1685_v54  ;;  %2141 = vmatmul.msk.f32.gmra.mxu1 %vm122_vm0, %v1347_v18  ;;  %v2116_v19 = vor.u32 %v2236_v62, %v2115_v9 }
 0x253   :  { %v1020_v61 = vpop.f32.mrf.mxu2 }
 0x254   :  { %v1265_v23 = vpop.f32.mrf.mxu0  ;;  %v1021_v59 = vadd.f32 %v2626_v17, %v1020_v61 }
 0x255   :  { %v1266_v1 = vadd.f32 %v1265_v23, %v1137_v21 }
 0x256   :  { %v1560_v27 = vpop.f32.mrf.mxu1 }
 0x257   :  { %v1348_v60 = vmax.f32 %v1266_v1, 0.0  ;;  %v1686_v30 = vpack.c.bf16 %v1560_v27, %v1560_v27  ;;  %v1141_v32 = vpop.f32.mrf.mxu3 }
 0x258   :  { %v1142_v38 = vadd.f32 %v1141_v32, %v1013_v44 }
 0x259   :  { %1735 = vst.msk [vmem:[%s2985_s7 + $0x24] sm:$0xf] %vm1725_vm3, %v1686_v30  ;;  %2142 = vmatmul.msk.f32.gmra.mxu1 %vm122_vm0, %v1348_v60 }
 0x25b   :  { %v1022_v57 = vpop.f32.mrf.mxu2 }
 0x25c   :  { %v1268_v40 = vpop.f32.mrf.mxu0  ;;  %1183 = vmatmul.bf16.gmra.mxu3 %v2100_v33  ;;  %v1023_v20 = vadd.f32 %v2626_v17, %v1022_v57  ;;  %v1323_v57 = vmax.f32 %v2631_v31, 0.0 }
 0x25d   :  { %v1269_v41 = vadd.f32 %v1268_v40, %v1140_v24 }
 0x25e   :  { %v1563_v42 = vpop.f32.mrf.mxu1 }
 0x25f   :  { %1307 = vmatmul.bf16.gmra.mxu0 %v2092_v36  ;;  %v1349_v34 = vmax.f32 %v1269_v41, 0.0  ;;  %v1687_v39 = vpack.c.bf16 %v1563_v42, %v1563_v42  ;;  %v1144_v45 = vpop.f32.mrf.mxu3 }
 0x260   :  { %v1145_v63 = vadd.f32 %v1144_v45, %v1016_v43 }
 0x261   :  { %1736 = vst.msk [vmem:[%s2985_s7 + $0x28] sm:$0xf] %vm1725_vm3, %v1687_v39  ;;  %2143 = vmatmul.msk.f32.gmra.mxu1 %vm122_vm0, %v1349_v34 }
 0x263   :  { %v1025_v28 = vpop.f32.mrf.mxu2 }
 0x264   :  { %v1270_v35 = vpop.f32.mrf.mxu0  ;;  %v1026_v32 = vadd.f32 %v2626_v17, %v1025_v28 }
 0x265   :  { %v1271_v48 = vadd.f32 %v1270_v35, %v1142_v38 }
 0x266   :  { %v1566_v49 = vpop.f32.mrf.mxu1 }
 0x267   :  { %v1350_v51 = vmax.f32 %v1271_v48, 0.0  ;;  %v1688_v47 = vpack.c.bf16 %v1566_v49, %v1566_v49  ;;  %v1146_v52 = vpop.f32.mrf.mxu3 }
 0x268   :  { %v1147_v12 = vadd.f32 %v1146_v52, %v1018_v7 }
 0x269   :  { %1737 = vst.msk [vmem:[%s2985_s7 + $0x2c] sm:$0xf] %vm1725_vm3, %v1688_v47  ;;  %2144 = vmatmul.msk.f32.gmra.mxu1 %vm122_vm0, %v1350_v51 }
 0x26b   :  { %v1027_v11 = vpop.f32.mrf.mxu2 }
 0x26c   :  { %v1273_v26 = vpop.f32.mrf.mxu0  ;;  %1188 = vmatmul.bf16.gmra.mxu3 %v2112_v10  ;;  %v1028_v45 = vadd.f32 %v2626_v17, %v1027_v11 }
 0x26d   :  { %v1274_v2 = vadd.f32 %v1273_v26, %v1145_v63 }
 0x26e   :  { %v1569_v50 = vpop.f32.mrf.mxu1 }
 0x26f   :  { %1312 = vmatmul.bf16.gmra.mxu0 %v2104_v0  ;;  %v1351_v3 = vmax.f32 %v1274_v2, 0.0  ;;  %v1689_v6 = vpack.c.bf16 %v1569_v50, %v1569_v50  ;;  %v1149_v8 = vpop.f32.mrf.mxu3 }
 0x270   :  { %v1150_v18 = vadd.f32 %v1149_v8, %v1021_v59 }
 0x271   :  { %1738 = vst.msk [vmem:[%s2985_s7 + $0x30] sm:$0xf] %vm1725_vm3, %v1689_v6  ;;  %2145 = vmatmul.msk.f32.gmra.mxu1 %vm122_vm0, %v1351_v3 }
 0x273   :  { %v1030_v54 = vpop.f32.mrf.mxu2 }
 0x274   :  { %v1275_v4 = vpop.f32.mrf.mxu0  ;;  %v1031_v43 = vadd.f32 %v2626_v17, %v1030_v54  ;;  %v2825_v17 = vld [vmem:[%s2983_s5] ss:$0 sm:$0xff] }
 0x275   :  { %v1276_v58 = vadd.f32 %v1275_v4, %v1147_v12 }
 0x276   :  { %v1572_v16 = vpop.f32.mrf.mxu1 }
 0x277   :  { %v1352_v56 = vmax.f32 %v1276_v58, 0.0  ;;  %v1690_v14 = vpack.c.bf16 %v1572_v16, %v1572_v16  ;;  %v1151_v5 = vpop.f32.mrf.mxu3 }
 0x278   :  { %v1152_v25 = vadd.f32 %v1151_v5, %v1023_v20 }
 0x279   :  { %1739 = vst.msk [vmem:[%s2985_s7 + $0x34] sm:$0xf] %vm1725_vm3, %v1690_v14  ;;  %2146 = vmatmul.msk.f32.gmra.mxu1 %vm122_vm0, %v1352_v56 }
 0x27b   :  { %v1032_v60 = vpop.f32.mrf.mxu2 }
 0x27c   :  { %v1278_v13 = vpop.f32.mrf.mxu0  ;;  %v1033_v0 = vadd.f32 %v2825_v17, %v1032_v60 }
 0x27d   :  { %v1279_v21 = vadd.f32 %v1278_v13, %v1150_v18 }
 0x27e   :  { %v1575_v23 = vpop.f32.mrf.mxu1 }
 0x27f   :  { %1317 = vmatmul.bf16.gmra.mxu0 %v2116_v19  ;;  %v1353_v61 = vmax.f32 %v1279_v21, 0.0  ;;  %v1691_v1 = vpack.c.bf16 %v1575_v23, %v1575_v23  ;;  %v1154_v22 = vpop.f32.mrf.mxu3 }
 0x280   :  { %v1155_v36 = vadd.f32 %v1154_v22, %v1026_v32 }
 0x281   :  { %1740 = vst.msk [vmem:[%s2985_s7 + $0x38] sm:$0xf] %vm1725_vm3, %v1691_v1  ;;  %2147 = vmatmul.msk.f32.gmra.mxu1 %vm122_vm0, %v1353_v61 }
 0x283   :  { %v1035_v34 = vpop.f32.mrf.mxu2 }
 0x284   :  { %v1280_v27 = vpop.f32.mrf.mxu0  ;;  %v1036_v7 = vadd.f32 %v2825_v17, %v1035_v34 }
 0x285   :  { %v1281_v30 = vadd.f32 %v1280_v27, %v1152_v25 }
 0x286   :  { %v1578_v53 = vpop.f32.mrf.mxu1 }
 0x287   :  { %v1354_v29 = vmax.f32 %v1281_v30, 0.0  ;;  %v1692_v33 = vpack.c.bf16 %v1578_v53, %v1578_v53  ;;  %v1156_v24 = vpop.f32.mrf.mxu3 }
 0x288   :  { %v1157_v35 = vadd.f32 %v1156_v24, %v1028_v45 }
 0x289   :  { %1741 = vst.msk [vmem:[%s2985_s7 + $0x3c] sm:$0xf] %vm1725_vm3, %v1692_v33  ;;  %2148 = vmatmul.msk.f32.gmra.mxu1 %vm122_vm0, %v1354_v29 }
 0x28b   :  { %v1037_v51 = vpop.f32.mrf.mxu2 }
 0x28c   :  { %v1283_v40 = vpop.f32.mrf.mxu0  ;;  %v1038_v62 = vadd.f32 %v2825_v17, %v1037_v51 }
 0x28d   :  { %v1284_v41 = vadd.f32 %v1283_v40, %v1155_v36 }
 0x28e   :  { %v1581_v42 = vpop.f32.mrf.mxu1 }
 0x28f   :  { %2117 = vmatmul.msk.f32.vlgmr.msrb.gmra.mxu0 %vm122_vm0, %v1323_v57  ;;  %v1355_v39 = vmax.f32 %v1284_v41, 0.0  ;;  %v1693_v44 = vpack.c.bf16 %v1581_v42, %v1581_v42  ;;  %v1159_v38 = vpop.f32.mrf.mxu3 }
 0x290   :  { %v1160_v47 = vadd.f32 %v1159_v38, %v1031_v43 }
 0x291   :  { %1742 = vst.msk [vmem:[%s2985_s7 + $0x40] sm:$0xf] %vm1725_vm3, %v1693_v44  ;;  %2149 = vmatmul.msk.f32.gmra.mxu1 %vm122_vm0, %v1355_v39 }
 0x293   :  { %v1040_v2 = vpop.f32.mrf.mxu2 }
 0x294   :  { %v1285_v48 = vpop.f32.mrf.mxu0  ;;  %v1041_v21 = vadd.f32 %v2825_v17, %v1040_v2 }
 0x295   :  { %v1286_v31 = vadd.f32 %v1285_v48, %v1157_v35 }
 0x296   :  { %v1584_v46 = vpop.f32.mrf.mxu1 }
 0x297   :  { %v1356_v37 = vmax.f32 %v1286_v31, 0.0  ;;  %v1694_v49 = vpack.c.bf16 %v1584_v46, %v1584_v46  ;;  %v1161_v28 = vpop.f32.mrf.mxu3 }
 0x298   :  { %v1162_v50 = vadd.f32 %v1161_v28, %v1033_v0 }
 0x299   :  { %1743 = vst.msk [vmem:[%s2985_s7 + $0x44] sm:$0xf] %vm1725_vm3, %v1694_v49  ;;  %2150 = vmatmul.msk.f32.gmra.mxu1 %vm122_vm0, %v1356_v37 }
 0x29b   :  { %v1042_v16 = vpop.f32.mrf.mxu2 }
 0x29c   :  { %v1288_v52 = vpop.f32.mrf.mxu0  ;;  %v1043_v29 = vadd.f32 %v2825_v17, %v1042_v16 }
 0x29d   :  { %v1289_v15 = vadd.f32 %v1288_v52, %v1160_v47 }
 0x29e   :  { %v1587_v55 = vpop.f32.mrf.mxu1 }
 0x29f   :  { %v1357_v10 = vmax.f32 %v1289_v15, 0.0  ;;  %v1695_v63 = vpack.c.bf16 %v1587_v55, %v1587_v55  ;;  %v1164_v26 = vpop.f32.mrf.mxu3 }
 0x2a0   :  { %v1165_v58 = vadd.f32 %v1164_v26, %v1036_v7 }
 0x2a1   :  { %1744 = vst.msk [vmem:[%s2985_s7 + $0x48] sm:$0xf] %vm1725_vm3, %v1695_v63  ;;  %2151 = vmatmul.msk.f32.gmra.mxu1 %vm122_vm0, %v1357_v10 }
 0x2a3   :  { %v1045_v61 = vpop.f32.mrf.mxu2 }
 0x2a4   :  { %v1290_v3 = vpop.f32.mrf.mxu0  ;;  %v1046_v41 = vadd.f32 %v2825_v17, %v1045_v61 }
 0x2a5   :  { %v1291_v6 = vadd.f32 %v1290_v3, %v1162_v50 }
 0x2a6   :  { %v1590_v8 = vpop.f32.mrf.mxu1 }
 0x2a7   :  { %v1358_v11 = vmax.f32 %v1291_v6, 0.0  ;;  %v1696_v12 = vpack.c.bf16 %v1590_v8, %v1590_v8  ;;  %v1166_v4 = vpop.f32.mrf.mxu3 }
 0x2a8   :  { %v1167_v54 = vadd.f32 %v1166_v4, %v1038_v62 }
 0x2a9   :  { %1745 = vst.msk [vmem:[%s2985_s7 + $0x4c] sm:$0xf] %vm1725_vm3, %v1696_v12  ;;  %2152 = vmatmul.msk.f32.gmra.mxu1 %vm122_vm0, %v1358_v11 }
 0x2ab   :  { %v1047_v24 = vpop.f32.mrf.mxu2 }
 0x2ac   :  { %v1293_v59 = vpop.f32.mrf.mxu0  ;;  %v1048_v37 = vadd.f32 %v2825_v17, %v1047_v24 }
 0x2ad   :  { %v1294_v56 = vadd.f32 %v1293_v59, %v1165_v58 }
 0x2ae   :  { %v1593_v14 = vpop.f32.mrf.mxu1 }
 0x2af   :  { %v1359_v5 = vmax.f32 %v1294_v56, 0.0  ;;  %v1697_v9 = vpack.c.bf16 %v1593_v14, %v1593_v14  ;;  %v1169_v18 = vpop.f32.mrf.mxu3 }
 0x2b0   :  { %v1170_v25 = vadd.f32 %v1169_v18, %v1041_v21 }
 0x2b1   :  { %1746 = vst.msk [vmem:[%s2985_s7 + $0x50] sm:$0xf] %vm1725_vm3, %v1697_v9  ;;  %2153 = vmatmul.msk.f32.gmra.mxu1 %vm122_vm0, %v1359_v5 }
 0x2b3   :  { %v1050_v38 = vpop.f32.mrf.mxu2 }
 0x2b4   :  { %v1295_v19 = vpop.f32.mrf.mxu0  ;;  %v1051_v15 = vadd.f32 %v2825_v17, %v1050_v38 }
 0x2b5   :  { %v1296_v13 = vadd.f32 %v1295_v19, %v1167_v54 }
 0x2b6   :  { %v1596_v23 = vpop.f32.mrf.mxu1 }
 0x2b7   :  { %v1360_v1 = vmax.f32 %v1296_v13, 0.0  ;;  %v1698_v20 = vpack.c.bf16 %v1596_v23, %v1596_v23  ;;  %v1171_v22 = vpop.f32.mrf.mxu3 }
 0x2b8   :  { %v1172_v36 = vadd.f32 %v1171_v22, %v1043_v29 }
 0x2b9   :  { %1747 = vst.msk [vmem:[%s2985_s7 + $0x54] sm:$0xf] %vm1725_vm3, %v1698_v20  ;;  %2154 = vmatmul.msk.f32.gmra.mxu1 %vm122_vm0, %v1360_v1 }
 0x2bb   :  { %v1052_v47 = vpop.f32.mrf.mxu2 }
 0x2bc   :  { %v1298_v27 = vpop.f32.mrf.mxu0  ;;  %v1053_v11 = vadd.f32 %v2825_v17, %v1052_v47 }
 0x2bd   :  { %v1299_v60 = vadd.f32 %v1298_v27, %v1170_v25 }
 0x2be   :  { %v1599_v30 = vpop.f32.mrf.mxu1 }
 0x2bf   :  { %v1361_v32 = vmax.f32 %v1299_v60, 0.0  ;;  %v1699_v53 = vpack.c.bf16 %v1599_v30, %v1599_v30  ;;  %v1174_v33 = vpop.f32.mrf.mxu3 }
 0x2c0   :  { %v1175_v45 = vadd.f32 %v1174_v33, %v1046_v41 }
 0x2c1   :  { %1748 = vst.msk [vmem:[%s2985_s7 + $0x58] sm:$0xf] %vm1725_vm3, %v1699_v53  ;;  %2155 = vmatmul.msk.f32.gmra.mxu1 %vm122_vm0, %v1361_v32 }
 0x2c3   :  { %v1055_v6 = vpop.f32.mrf.mxu2 }
 0x2c4   :  { %v1300_v40 = vpop.f32.mrf.mxu0  ;;  %v1056_v16 = vadd.f32 %v2825_v17, %v1055_v6 }
 0x2c5   :  { %v1301_v57 = vadd.f32 %v1300_v40, %v1172_v36 }
 0x2c6   :  { %v1602_v42 = vpop.f32.mrf.mxu1 }
 0x2c7   :  { %v1362_v34 = vmax.f32 %v1301_v57, 0.0  ;;  %v1700_v39 = vpack.c.bf16 %v1602_v42, %v1602_v42  ;;  %v1176_v44 = vpop.f32.mrf.mxu3 }
 0x2c8   :  { %v1177_v28 = vadd.f32 %v1176_v44, %v1048_v37 }
 0x2c9   :  { %1749 = vst.msk [vmem:[%s2985_s7 + $0x5c] sm:$0xf] %vm1725_vm3, %v1700_v39  ;;  %2156 = vmatmul.msk.f32.gmra.mxu1 %vm122_vm0, %v1362_v34 }
 0x2cb   :  { %v1057_v9 = vpop.f32.mrf.mxu2 }
 0x2cc   :  { %v1303_v35 = vpop.f32.mrf.mxu0  ;;  %v1058_v61 = vadd.f32 %v2825_v17, %v1057_v9 }
 0x2cd   :  { %v1304_v48 = vadd.f32 %v1303_v35, %v1175_v45 }
 0x2ce   :  { %v1605_v31 = vpop.f32.mrf.mxu1 }
 0x2cf   :  { %v1363_v43 = vmax.f32 %v1304_v48, 0.0  ;;  %v1701_v46 = vpack.c.bf16 %v1605_v31, %v1605_v31  ;;  %v1179_v49 = vpop.f32.mrf.mxu3 }
 0x2d0   :  { %v1180_v26 = vadd.f32 %v1179_v49, %v1051_v15 }
 0x2d1   :  { %1750 = vst.msk [vmem:[%s2985_s7 + $0x60] sm:$0xf] %vm1725_vm3, %v1701_v46  ;;  %2157 = vmatmul.msk.f32.gmra.mxu1 %vm122_vm0, %v1363_v43 }
 0x2d3   :  { %v1060_v1 = vpop.f32.mrf.mxu2 }
 0x2d4   :  { %v1305_v51 = vpop.f32.mrf.mxu0  ;;  %v1061_v27 = vadd.f32 %v2825_v17, %v1060_v1 }
 0x2d5   :  { %v1306_v52 = vadd.f32 %v1305_v51, %v1177_v28 }
 0x2d6   :  { %v1608_v55 = vpop.f32.mrf.mxu1 }
 0x2d7   :  { %v1364_v10 = vmax.f32 %v1306_v52, 0.0  ;;  %v1702_v63 = vpack.c.bf16 %v1608_v55, %v1608_v55  ;;  %v1181_v0 = vpop.f32.mrf.mxu3 }
 0x2d8   :  { %v1182_v4 = vadd.f32 %v1181_v0, %v1053_v11 }
 0x2d9   :  { %1751 = vst.msk [vmem:[%s2985_s7 + $0x64] sm:$0xf] %vm1725_vm3, %v1702_v63  ;;  %2158 = vmatmul.msk.f32.gmra.mxu1 %vm122_vm0, %v1364_v10 }
 0x2db   :  { %v1062_v24 = vpop.f32.mrf.mxu2 }
 0x2dc   :  { %v1308_v2 = vpop.f32.mrf.mxu0  ;;  %v1063_v42 = vadd.f32 %v2825_v17, %v1062_v24 }
 0x2dd   :  { %v1309_v50 = vadd.f32 %v1308_v2, %v1180_v26 }
 0x2de   :  { %v1611_v3 = vpop.f32.mrf.mxu1 }
 0x2df   :  { %v1365_v7 = vmax.f32 %v1309_v50, 0.0  ;;  %v1703_v8 = vpack.c.bf16 %v1611_v3, %v1611_v3  ;;  %v1184_v12 = vpop.f32.mrf.mxu3 }
 0x2e0   :  { %v1185_v62 = vadd.f32 %v1184_v12, %v1056_v16 }
 0x2e1   :  { %1752 = vst.msk [vmem:[%s2985_s7 + $0x68] sm:$0xf] %vm1725_vm3, %v1703_v8  ;;  %2159 = vmatmul.msk.f32.gmra.mxu1 %vm122_vm0, %v1365_v7 }
 0x2e4   :  { %v1310_v58 = vpop.f32.mrf.mxu0 }
 0x2e5   :  { %v1311_v59 = vadd.f32 %v1310_v58, %v1182_v4 }
 0x2e6   :  { %v1614_v56 = vpop.f32.mrf.mxu1 }
 0x2e7   :  { %v1366_v14 = vmax.f32 %v1311_v59, 0.0  ;;  %v1704_v5 = vpack.c.bf16 %v1614_v56, %v1614_v56  ;;  %v1186_v54 = vpop.f32.mrf.mxu3 }
 0x2e8   :  { %v1187_v20 = vadd.f32 %v1186_v54, %v1058_v61 }
 0x2e9   :  { %1753 = vst.msk [vmem:[%s2985_s7 + $0x6c] sm:$0xf] %vm1725_vm3, %v1704_v5  ;;  %2160 = vmatmul.msk.f32.gmra.mxu1 %vm122_vm0, %v1366_v14 }
 0x2ec   :  { %v1313_v18 = vpop.f32.mrf.mxu0 }
 0x2ed   :  { %v1314_v19 = vadd.f32 %v1313_v18, %v1185_v62 }
 0x2ee   :  { %v1617_v13 = vpop.f32.mrf.mxu1 }
 0x2ef   :  { %v1367_v21 = vmax.f32 %v1314_v19, 0.0  ;;  %v1705_v23 = vpack.c.bf16 %v1617_v13, %v1617_v13  ;;  %v1189_v30 = vpop.f32.mrf.mxu3 }
 0x2f0   :  { %v1190_v29 = vadd.f32 %v1189_v30, %v1061_v27 }
 0x2f1   :  { %1754 = vst.msk [vmem:[%s2985_s7 + $0x70] sm:$0xf] %vm1725_vm3, %v1705_v23  ;;  %2161 = vmatmul.msk.f32.gmra.mxu1 %vm122_vm0, %v1367_v21 }
 0x2f4   :  { %v1315_v22 = vpop.f32.mrf.mxu0 }
 0x2f5   :  { %v1316_v25 = vadd.f32 %v1315_v22, %v1187_v20 }
 0x2f6   :  { %v1620_v60 = vpop.f32.mrf.mxu1 }
 0x2f7   :  { %v1368_v32 = vmax.f32 %v1316_v25, 0.0  ;;  %v1706_v53 = vpack.c.bf16 %v1620_v60, %v1620_v60  ;;  %v1191_v34 = vpop.f32.mrf.mxu3 }
 0x2f8   :  { %v1192_v39 = vadd.f32 %v1191_v34, %v1063_v42 }
 0x2f9   :  { %1755 = vst.msk [vmem:[%s2985_s7 + $0x74] sm:$0xf] %vm1725_vm3, %v1706_v53  ;;  %2162 = vmatmul.msk.f32.gmra.mxu1 %vm122_vm0, %v1368_v32 }
 0x2fc   :  { %v1318_v33 = vpop.f32.mrf.mxu0 }
 0x2fd   :  { %v1319_v36 = vadd.f32 %v1318_v33, %v1190_v29 }
 0x2fe   :  { %v1623_v40 = vpop.f32.mrf.mxu1 }
 0x2ff   :  { %v1369_v57 = vmax.f32 %v1319_v36, 0.0  ;;  %v1707_v41 = vpack.c.bf16 %v1623_v40, %v1623_v40 }
 0x301   :  { %1756 = vst.msk [vmem:[%s2985_s7 + $0x78] sm:$0xf] %vm1725_vm3, %v1707_v41  ;;  %2163 = vmatmul.msk.f32.gmra.mxu1 %vm122_vm0, %v1369_v57 }
 0x304   :  { %v1320_v44 = vpop.f32.mrf.mxu0 }
 0x305   :  { %v1321_v45 = vadd.f32 %v1320_v44, %v1192_v39 }
 0x306   :  { %v1626_v38 = vpop.f32.mrf.mxu1 }
 0x307   :  { %v1370_v35 = vmax.f32 %v1321_v45, 0.0  ;;  %v1708_v48 = vpack.c.bf16 %v1626_v38, %v1626_v38 }
 0x309   :  { %1757 = vst.msk [vmem:[%s2985_s7 + $0x7c] sm:$0xf] %vm1725_vm3, %v1708_v48  ;;  %2164 = vmatmul.msk.f32.gmra.mxu1 %vm122_vm0, %v1370_v35 }
 0x30c   :  { %v1533_v17 = vpop.f32.mrf.mxu0 }
 0x30d   :  { %v1677_v31 = vpack.c.bf16 %v1533_v17, %v1533_v17 }
 0x30e   :  { %v1629_v43 = vpop.f32.mrf.mxu1 }
 0x30f   :  { %1726 = vst.msk [vmem:[%s2985_s7] sm:$0xf] %vm1725_vm3, %v1677_v31  ;;  %v1709_v46 = vpack.c.bf16 %v1629_v43, %v1629_v43 }
 0x311   :  { %1758 = vst.msk [vmem:[%s2985_s7 + $0x80] sm:$0xf] %vm1725_vm3, %v1709_v46 }
 0x316   :  { %v1632_v37 = vpop.f32.mrf.mxu1 }
 0x317   :  { %v1710_v49 = vpack.c.bf16 %v1632_v37, %v1632_v37 }
 0x319   :  { %1759 = vst.msk [vmem:[%s2985_s7 + $0x84] sm:$0xf] %vm1725_vm3, %v1710_v49 }
 0x31e   :  { %v1635_v28 = vpop.f32.mrf.mxu1 }
 0x31f   :  { %v1711_v51 = vpack.c.bf16 %v1635_v28, %v1635_v28 }
 0x321   :  { %1760 = vst.msk [vmem:[%s2985_s7 + $0x88] sm:$0xf] %vm1725_vm3, %v1711_v51 }
 0x326   :  { %v1638_v47 = vpop.f32.mrf.mxu1 }
 0x327   :  { %v1712_v52 = vpack.c.bf16 %v1638_v47, %v1638_v47 }
 0x329   :  { %1761 = vst.msk [vmem:[%s2985_s7 + $0x8c] sm:$0xf] %vm1725_vm3, %v1712_v52 }
 0x32e   :  { %v1641_v15 = vpop.f32.mrf.mxu1 }
 0x32f   :  { %v1713_v55 = vpack.c.bf16 %v1641_v15, %v1641_v15 }
 0x331   :  { %1762 = vst.msk [vmem:[%s2985_s7 + $0x90] sm:$0xf] %vm1725_vm3, %v1713_v55 }
 0x336   :  { %v1644_v10 = vpop.f32.mrf.mxu1 }
 0x337   :  { %v1714_v63 = vpack.c.bf16 %v1644_v10, %v1644_v10 }
 0x339   :  { %1763 = vst.msk [vmem:[%s2985_s7 + $0x94] sm:$0xf] %vm1725_vm3, %v1714_v63 }
 0x33e   :  { %v1647_v0 = vpop.f32.mrf.mxu1 }
 0x33f   :  { %v1715_v26 = vpack.c.bf16 %v1647_v0, %v1647_v0 }
 0x341   :  { %1764 = vst.msk [vmem:[%s2985_s7 + $0x98] sm:$0xf] %vm1725_vm3, %v1715_v26 }
 0x346   :  { %v1650_v2 = vpop.f32.mrf.mxu1 }
 0x347   :  { %v1716_v50 = vpack.c.bf16 %v1650_v2, %v1650_v2 }
 0x349   :  { %1765 = vst.msk [vmem:[%s2985_s7 + $0x9c] sm:$0xf] %vm1725_vm3, %v1716_v50 }
 0x34e   :  { %v1653_v3 = vpop.f32.mrf.mxu1 }
 0x34f   :  { %v1717_v6 = vpack.c.bf16 %v1653_v3, %v1653_v3 }
 0x351   :  { %1766 = vst.msk [vmem:[%s2985_s7 + $0xa0] sm:$0xf] %vm1725_vm3, %v1717_v6 }
 0x356   :  { %v1656_v7 = vpop.f32.mrf.mxu1 }
 0x357   :  { %v1718_v8 = vpack.c.bf16 %v1656_v7, %v1656_v7 }
 0x359   :  { %1767 = vst.msk [vmem:[%s2985_s7 + $0xa4] sm:$0xf] %vm1725_vm3, %v1718_v8 }
 0x35e   :  { %v1659_v11 = vpop.f32.mrf.mxu1 }
 0x35f   :  { %v1719_v12 = vpack.c.bf16 %v1659_v11, %v1659_v11 }
 0x361   :  { %1768 = vst.msk [vmem:[%s2985_s7 + $0xa8] sm:$0xf] %vm1725_vm3, %v1719_v12 }
 0x366   :  { %v1662_v4 = vpop.f32.mrf.mxu1 }
 0x367   :  { %v1720_v58 = vpack.c.bf16 %v1662_v4, %v1662_v4 }
 0x369   :  { %1769 = vst.msk [vmem:[%s2985_s7 + $0xac] sm:$0xf] %vm1725_vm3, %v1720_v58 }
 0x36e   :  { %v1665_v59 = vpop.f32.mrf.mxu1 }
 0x36f   :  { %v1721_v16 = vpack.c.bf16 %v1665_v59, %v1665_v59 }
 0x371   :  { %1770 = vst.msk [vmem:[%s2985_s7 + $0xb0] sm:$0xf] %vm1725_vm3, %v1721_v16 }
 0x376   :  { %v1668_v56 = vpop.f32.mrf.mxu1 }
 0x377   :  { %v1722_v14 = vpack.c.bf16 %v1668_v56, %v1668_v56 }
 0x379   :  { %1771 = vst.msk [vmem:[%s2985_s7 + $0xb4] sm:$0xf] %vm1725_vm3, %v1722_v14 }
 0x37e   :  { %v1671_v5 = vpop.f32.mrf.mxu1 }
 0x37f   :  { %v1723_v9 = vpack.c.bf16 %v1671_v5, %v1671_v5 }
 0x381   :  { %1772 = vst.msk [vmem:[%s2985_s7 + $0xb8] sm:$0xf] %vm1725_vm3, %v1723_v9 }
 0x386   :  { %v1674_v62 = vpop.f32.mrf.mxu1 }
 0x387   :  { %v1724_v18 = vpack.c.bf16 %v1674_v62, %v1674_v62 }
 0x389   :  { %1773 = vst.msk [vmem:[%s2985_s7 + $0xbc] sm:$0xf] %vm1725_vm3, %v1724_v18 }
 0x38a   :  { %1778 = vsyncpa [#allocation3], 1 }

</bundles_post_ra>
